<compile_context>
chip_gen: v6e
topology: v6e:2x2x1
jax: 0.10.0
libtpu: 0.0.40
codegen_flags: <defaults>
</compile_context>

<pallas_src>
import math
from functools import partial

import numpy as np
import jax
import jax.numpy as jnp
from jax.experimental import pallas as pl
from jax.experimental.pallas import tpu as pltpu

BN_EPS = 1e-5
_MM_DTYPE = jnp.bfloat16    # MXU operand dtype (set to jnp.float32 for parity tests)
_ACT_DTYPE = jnp.bfloat16   # inter-layer activation storage dtype


def _round_up(a, b):
    return (a + b - 1) // b * b


def _tpu_vmem_capacity_bytes():
    try:
        return int(pltpu.get_tpu_info().vmem_capacity_bytes)
    except Exception:
        return 64 * 1024 * 1024                 # conservative (v7x-sized) fallback


_VMEM_CAP = _tpu_vmem_capacity_bytes()
_VMEM_LIMIT = min(_VMEM_CAP * 3 // 4, 100 * 1024 * 1024)     # leave headroom
_K_TILE_MAX = 4096 if _VMEM_CAP >= 100 * 1024 * 1024 else 2048


def _row_tile(ho):
    for t in range(min(ho, 16), 0, -1):
        if ho % t == 0:
            return t
    return 1


# ---------------------------------------------------------------------------
# Pallas kernel 1: direct fused 3x3 stride-1 convolution (no HBM im2col)
#   out = [prelu](sum_taps x_shifted @ w_tap + bias) + residual
# ---------------------------------------------------------------------------
def _conv3x3_kernel(*refs, TH, Wo, has_bias, has_prelu, has_add):
    xm_ref, xh1_ref, xh2_ref, w_ref = refs[:4]
    idx = 4
    bias_ref = alpha_ref = res_ref = None
    if has_bias:
        bias_ref = refs[idx]; idx += 1
    if has_prelu:
        alpha_ref = refs[idx]; idx += 1
    if has_add:
        res_ref = refs[idx]; idx += 1
    o_ref = refs[idx]

    cin = xm_ref.shape[-1]
    cout = w_ref.shape[-1]
    # (TH+2, Wp, Cin) input window = main row tile + two 1-row halos (pipelined)
    xw = jnp.concatenate([xm_ref[...], xh1_ref[...], xh2_ref[...]], axis=0)

    acc = jnp.zeros((TH * Wo, cout), jnp.float32)
    for kw in range(3):
        xc = xw[:, kw:kw + Wo, :]                       # column-shifted view (VMEM)
        for kh in range(3):
            xs = xc[kh:kh + TH].reshape(TH * Wo, cin)   # bf16 operand
            acc = acc + jnp.dot(xs, w_ref[kh * 3 + kw],
                                preferred_element_type=jnp.float32)
    y = acc
    if has_bias:
        y = y + bias_ref[...]
    if has_prelu:
        y = jnp.where(y >= 0.0, y, y * alpha_ref[...])
    y = y.reshape(TH, Wo, cout)
    if has_add:
        y = y + res_ref[...].astype(jnp.float32)
    o_ref[...] = y.astype(o_ref.dtype)


@partial(jax.jit, static_argnames=("out_dtype",))
def conv3x3_s1(xp, w9, bias=None, prelu_alpha=None, residual=None, *,
               out_dtype=_ACT_DTYPE):
    """xp: (N, H+2, W+2, Cin) spatially padded NHWC; w9: (9, Cin, Cout) tap-major."""
    N, Hp, Wp, Cin = xp.shape
    Ho, Wo = Hp - 2, Wp - 2
    Cout = w9.shape[-1]
    TH = _row_tile(Ho)

    xp = xp.astype(_MM_DTYPE)
    has_bias = bias is not None
    has_prelu = prelu_alpha is not None
    has_add = residual is not None

    inputs = [xp, xp, xp, w9.astype(_MM_DTYPE)]
    in_specs = [
        pl.BlockSpec((None, TH, Wp, Cin), lambda n, h: (n, h, 0, 0)),
        pl.BlockSpec((None, 1, Wp, Cin), lambda n, h: (n, h * TH + TH, 0, 0)),
        pl.BlockSpec((None, 1, Wp, Cin), lambda n, h: (n, h * TH + TH + 1, 0, 0)),
        pl.BlockSpec((9, Cin, Cout), lambda n, h: (0, 0, 0)),   # resident weights
    ]
    if has_bias:
        inputs.append(bias.astype(jnp.float32))
        in_specs.append(pl.BlockSpec((1, Cout), lambda n, h: (0, 0)))
    if has_prelu:
        inputs.append(prelu_alpha.astype(jnp.float32))
        in_specs.append(pl.BlockSpec((1, Cout), lambda n, h: (0, 0)))
    if has_add:
        inputs.append(residual)
        in_specs.append(pl.BlockSpec((None, TH, Wo, Cout), lambda n, h: (n, h, 0, 0)))

    kernel = partial(_conv3x3_kernel, TH=TH, Wo=Wo,
                     has_bias=has_bias, has_prelu=has_prelu, has_add=has_add)
    return pl.pallas_call(
        kernel,
        out_shape=jax.ShapeDtypeStruct((N, Ho, Wo, Cout), out_dtype),
        grid_spec=pltpu.PrefetchScalarGridSpec(
            num_scalar_prefetch=0,
            grid=(N, Ho // TH),
            in_specs=in_specs,
            out_specs=pl.BlockSpec((None, TH, Wo, Cout), lambda n, h: (n, h, 0, 0)),
        ),
        compiler_params=pltpu.CompilerParams(
            dimension_semantics=("parallel", "parallel"),
            vmem_limit_bytes=_VMEM_LIMIT),
    )(*inputs)


# ---------------------------------------------------------------------------
# Pallas kernel 2: fused (K-tiled) matmul with optional bias / PReLU / residual
# (used for the 4 stride-2 im2col convs, 1x1 shortcut convs and the linears)
# ---------------------------------------------------------------------------
def _matmul_kernel(*refs, has_bias, has_prelu, has_add):
    x_ref, w_ref = refs[0], refs[1]
    idx = 2
    bias_ref = alpha_ref = add_ref = None
    if has_bias:
        bias_ref = refs[idx]; idx += 1
    if has_prelu:
        alpha_ref = refs[idx]; idx += 1
    if has_add:
        add_ref = refs[idx]; idx += 1
    o_ref, acc_ref = refs[idx], refs[idx + 1]

    k = pl.program_id(2)

    @pl.when(k == 0)
    def _():
        acc_ref[...] = jnp.zeros_like(acc_ref)

    acc_ref[...] += jnp.dot(x_ref[...], w_ref[...],
                            preferred_element_type=jnp.float32)

    @pl.when(k == pl.num_programs(2) - 1)
    def _():
        y = acc_ref[...]
        if has_bias:
            y = y + bias_ref[...]
        if has_prelu:
            y = jnp.where(y >= 0.0, y, y * alpha_ref[...])
        if has_add:
            y = y + add_ref[...].astype(jnp.float32)
        o_ref[...] = y.astype(o_ref.dtype)


def _choose_mm_tiles(M, N, K):
    # lane-dense output tiles (no pad when already 128-aligned)
    if N % 128 == 0:
        Np = N
        tn = 512 if N % 512 == 0 else (256 if N % 256 == 0 else 128)
    else:
        Np, tn = _round_up(N, 128), 128
    # sublane tiles
    if M >= 512:
        tm = next((t for t in (512, 256, 128) if M % t == 0), None)
        Mp = M if tm is not None else _round_up(M, 256)
        tm = tm if tm is not None else 256
    else:
        tm = _round_up(M, 8)
        Mp = tm
    # contraction: full-K resident when it fits the (generation-gated) cap
    if K % 8 == 0 and K <= _K_TILE_MAX:
        tk, Kp = K, K
    else:
        tk = next((t for t in (2048, 1024, 512, 256, 128)
                   if t <= _K_TILE_MAX and K % t == 0), None)
        if tk is None:
            tk = min(1024, _K_TILE_MAX)
            Kp = _round_up(K, tk)
        else:
            Kp = K
    return tm, tn, tk, Mp, Np, Kp


def _pad2(a, rows, cols):
    pr, pc = rows - a.shape[0], cols - a.shape[1]
    return a if pr == 0 and pc == 0 else jnp.pad(a, ((0, pr), (0, pc)))


@partial(jax.jit, static_argnames=("out_dtype",))
def matmul_fused(x, w, bias=None, prelu_alpha=None, residual=None, *,
                 out_dtype=jnp.float32):
    M, K = x.shape
    Kw, N = w.shape
    assert K == Kw
    tm, tn, tk, Mp, Np, Kp = _choose_mm_tiles(M, N, K)

    has_bias = bias is not None
    has_prelu = prelu_alpha is not None
    has_add = residual is not None

    inputs = [_pad2(x.astype(_MM_DTYPE), Mp, Kp),
              _pad2(w.astype(_MM_DTYPE), Kp, Np)]
    in_specs = [pl.BlockSpec((tm, tk), lambda i, j, k: (i, k)),
                pl.BlockSpec((tk, tn), lambda i, j, k: (k, j))]
    if has_bias:
        inputs.append(_pad2(bias.astype(jnp.float32), 1, Np))
        in_specs.append(pl.BlockSpec((1, tn), lambda i, j, k: (0, j)))
    if has_prelu:
        inputs.append(_pad2(prelu_alpha.astype(jnp.float32), 1, Np))
        in_specs.append(pl.BlockSpec((1, tn), lambda i, j, k: (0, j)))
    if has_add:
        inputs.append(_pad2(residual, Mp, Np))
        in_specs.append(pl.BlockSpec((tm, tn), lambda i, j, k: (i, j)))

    kernel = partial(_matmul_kernel, has_bias=has_bias, has_prelu=has_prelu,
                     has_add=has_add)
    out = pl.pallas_call(
        kernel,
        out_shape=jax.ShapeDtypeStruct((Mp, Np), out_dtype),
        grid_spec=pltpu.PrefetchScalarGridSpec(
            num_scalar_prefetch=0,
            grid=(Mp // tm, Np // tn, Kp // tk),
            in_specs=in_specs,
            out_specs=pl.BlockSpec((tm, tn), lambda i, j, k: (i, j)),
            scratch_shapes=[pltpu.VMEM((tm, tn), jnp.float32)]),
        compiler_params=pltpu.CompilerParams(
            dimension_semantics=("parallel", "parallel", "arbitrary"),
            vmem_limit_bytes=_VMEM_LIMIT),
    )(*inputs)
    return out if (Mp == M and Np == N) else out[:M, :N]


# ---------------------------------------------------------------------------
# Pallas kernel 3: gridded per-channel affine (inference BN), f32 output
# ---------------------------------------------------------------------------
def _affine_kernel(x_ref, s_ref, b_ref, o_ref):
    o_ref[...] = x_ref[...].astype(jnp.float32) * s_ref[...] + b_ref[...]


@jax.jit
def channel_affine(x2d, scale, shift):
    M, C = x2d.shape
    TM = 256 if M > 256 else _round_up(max(M, 1), 8)
    Mp = _round_up(M, TM)
    xp = x2d if Mp == M else jnp.pad(x2d, ((0, Mp - M), (0, 0)))
    out = pl.pallas_call(
        _affine_kernel,
        out_shape=jax.ShapeDtypeStruct((Mp, C), jnp.float32),
        grid_spec=pltpu.PrefetchScalarGridSpec(
            num_scalar_prefetch=0, grid=(Mp // TM,),
            in_specs=[pl.BlockSpec((TM, C), lambda i: (i, 0)),
                      pl.BlockSpec((1, C), lambda i: (0, 0)),
                      pl.BlockSpec((1, C), lambda i: (0, 0))],
            out_specs=pl.BlockSpec((TM, C), lambda i: (i, 0))),
        compiler_params=pltpu.CompilerParams(
            dimension_semantics=("parallel",),
            vmem_limit_bytes=_VMEM_LIMIT),
    )(xp, scale.astype(jnp.float32), shift.astype(jnp.float32))
    return out if Mp == M else out[:M]


# ---------------------------------------------------------------------------
# Glue (XLA): spatial pad (+ fused pre-BN affine), stride-2 im2col, pooling
# ---------------------------------------------------------------------------
def _im2col3x3_s2(xp):
    """im2col for the few stride-2 3x3 convs; xp is already spatially padded."""
    N, Hp, Wp, C = xp.shape
    Ho = (Hp - 3) // 2 + 1
    Wo = (Wp - 3) // 2 + 1
    cols = [xp[:, kh:kh + 2 * Ho:2, kw:kw + 2 * Wo:2, :]
            for kh in range(3) for kw in range(3)]
    patches = jnp.concatenate(cols, axis=-1).reshape(N * Ho * Wo, 9 * C)
    return patches, Ho, Wo


def _pool_matrix(in_size, out_size):
    m = np.zeros((out_size, in_size), np.float32)
    for i in range(out_size):
        a = (i * in_size) // out_size
        b = -(-((i + 1) * in_size) // out_size)
        m[i, a:b] = 1.0 / (b - a)
    return jnp.asarray(m)


def adaptive_avg_pool2d(x, out_hw):
    rh = _pool_matrix(x.shape[1], out_hw[0])
    rw = _pool_matrix(x.shape[2], out_hw[1])
    y = jnp.einsum("ih,nhwc->niwc", rh, x)
    return jnp.einsum("jw,niwc->nijc", rw, y)


# ---------------------------------------------------------------------------
# Module forward
# ---------------------------------------------------------------------------
def bottleneck_ir(x, p, stride):
    # TODO(synk): the reference bottleneck_IR only defines shortcut_layer (its
    # res_layer / forward are truncated); the canonical pSp/InsightFace IR block
    # is used: out = (BN -> Conv3x3(s=1) -> PReLU -> Conv3x3(s) -> BN)(x) + shortcut(x).
    N, H, W, C = x.shape
    depth = p["res_w1"].shape[-1]

    # shortcut branch
    if "shortcut_w" in p:                                    # Conv1x1(stride) + BN folded
        xs = x[:, ::stride, ::stride, :]
        Ns, Hs, Ws, _ = xs.shape
        sc = matmul_fused(xs.reshape(Ns * Hs * Ws, C), p["shortcut_w"],
                          bias=p["shortcut_b"], out_dtype=_ACT_DTYPE)
        sc = sc.reshape(Ns, Hs, Ws, depth)
    else:                                                    # MaxPool2d(1, stride)
        sc = x[:, ::stride, ::stride, :]

    # residual branch: pre-BN affine fused into the (needed-anyway) spatial pad copy
    h = jnp.pad(x.astype(jnp.float32) * p["bn1_scale"] + p["bn1_shift"],
                ((0, 0), (1, 1), (1, 1), (0, 0))).astype(_MM_DTYPE)
    h = conv3x3_s1(h, p["res_w1"], prelu_alpha=p["alpha"], out_dtype=_ACT_DTYPE)

    hp = jnp.pad(h, ((0, 0), (1, 1), (1, 1), (0, 0)))
    if stride == 1:                                          # conv2 (+folded BN2) + residual
        out = conv3x3_s1(hp, p["res_w2"], bias=p["bn2_shift"], residual=sc,
                         out_dtype=_ACT_DTYPE)
    else:                                                    # 4 stride-2 convs: im2col fallback
        patches, Ho, Wo = _im2col3x3_s2(hp)
        out = matmul_fused(patches, p["res_w2_mat"], bias=p["bn2_shift"],
                           residual=sc.reshape(-1, depth), out_dtype=_ACT_DTYPE)
        out = out.reshape(N, Ho, Wo, depth)
    return out


def encoder_forward(x_nchw, params, block_strides, n_styles):
    f32 = jnp.float32
    x = jnp.transpose(x_nchw.astype(f32), (0, 2, 3, 1))          # NCHW -> NHWC

    # input_layer: Conv3x3(input_nc->64, s=1, p=1, no bias) + BN(64) + PReLU(64)
    il = params["input_layer"]
    xp = jnp.pad(x, ((0, 0), (1, 1), (1, 1), (0, 0))).astype(_MM_DTYPE)
    x = conv3x3_s1(xp, il["w9"], bias=il["bias"], prelu_alpha=il["alpha"],
                   out_dtype=_ACT_DTYPE)

    for p, stride in zip(params["body"], block_strides):
        x = bottleneck_ir(x, p, stride)

    # output_layer_2: BN(512) + AdaptiveAvgPool2d(7,7) + Flatten + Linear(512*49, 512)
    # TODO(synk): the reference spells it nn.Linaer; a standard nn.Linear is used.
    ol = params["output_layer_2"]
    N, H, W, C = x.shape
    xb = channel_affine(x.reshape(N * H * W, C), ol["bn_scale"], ol["bn_shift"])
    xb = adaptive_avg_pool2d(xb.reshape(N, H, W, C), (7, 7))
    xflat = xb.reshape(N, 7 * 7 * 512).astype(_MM_DTYPE)         # HWC order; fc_w pre-permuted
    y = matmul_fused(xflat, ol["fc_w"], bias=ol["fc_b"], out_dtype=f32)

    # TODO(synk): EqualLinear is not defined in the reference; the standard
    # StyleGAN2/pSp EqualLinear is used: out = x @ (W * lr_mul/sqrt(in)).T + b*lr_mul.
    lin = params["linear"]
    y = matmul_fused(y.astype(_MM_DTYPE), lin["w"], bias=lin["b"], out_dtype=f32)
    return y.reshape(-1, n_styles, 512)


# ---------------------------------------------------------------------------
# Parameters: PyTorch-layout init + one-time conversion to kernel layouts
# ---------------------------------------------------------------------------
class KeyGen:
    def __init__(self, seed):
        self._key = jax.random.PRNGKey(seed)

    def __call__(self):
        self._key, sub = jax.random.split(self._key)
        return sub


def init_bn(kg, c):
    return {
        "gamma": 1.0 + 0.1 * jax.random.normal(kg(), (c,), jnp.float32),
        "beta": 0.05 * jax.random.normal(kg(), (c,), jnp.float32),
        "mean": 0.05 * jax.random.normal(kg(), (c,), jnp.float32),
        "var": 1.0 + 0.1 * jax.random.uniform(kg(), (c,), jnp.float32),
    }


def init_conv(kg, out_c, in_c, k):
    fan_in = in_c * k * k
    return jax.random.normal(kg(), (out_c, in_c, k, k), jnp.float32) * math.sqrt(2.0 / fan_in)


def get_blocks_cfg(num_layers):
    assert num_layers in (50, 100, 152)

    def block(in_c, depth, n, stride=2):
        return [(in_c, depth, stride)] + [(depth, depth, 1)] * (n - 1)

    return (block(64, 64, 3) + block(64, 128, 4) +
            block(128, 256, 14) + block(256, 512, 3))


def init_raw_params(kg, input_nc, n_styles, num_layers=50):
    params = {
        "input_layer": {
            "w": init_conv(kg, 64, input_nc, 3),
            "bn": init_bn(kg, 64),
            "prelu": jnp.full((64,), 0.25, jnp.float32),
        },
        "body": [],
    }
    for (in_c, depth, stride) in get_blocks_cfg(num_layers):
        p = {
            "in_c": in_c, "depth": depth, "stride": stride,
            "res_bn1": init_bn(kg, in_c),
            "res_w1": init_conv(kg, depth, in_c, 3),
            "prelu": jnp.full((depth,), 0.25, jnp.float32),
            "res_w2": init_conv(kg, depth, depth, 3),
            "res_bn2": init_bn(kg, depth),
        }
        if in_c != depth:
            p["shortcut_w"] = init_conv(kg, depth, in_c, 1)
            p["shortcut_bn"] = init_bn(kg, depth)
        params["body"].append(p)
    params["output_layer_2"] = {
        "bn": init_bn(kg, 512),
        "fc_w": jax.random.normal(kg(), (512, 512 * 7 * 7), jnp.float32)
                * math.sqrt(1.0 / (512 * 7 * 7)),               # nn.Linear (out, in)
        "fc_b": 0.01 * jax.random.normal(kg(), (512,), jnp.float32),
    }
    params["linear"] = {                                        # EqualLinear(512, 512*n_styles)
        "w": jax.random.normal(kg(), (512 * n_styles, 512), jnp.float32),
        "b": jnp.zeros((512 * n_styles,), jnp.float32),
        "lr_mul": 1.0,
    }
    return params


def _fold_bn(bn):
    s = bn["gamma"] / jnp.sqrt(bn["var"] + BN_EPS)
    return s, bn["beta"] - bn["mean"] * s


def _conv_taps(w_oihw, out_scale=None):
    # PyTorch (O, I, KH, KW) -> tap-major (9, I, O); optional per-O scale (BN fold)
    o, i = w_oihw.shape[0], w_oihw.shape[1]
    w = jnp.transpose(w_oihw, (2, 3, 1, 0)).reshape(9, i, o)
    if out_scale is not None:
        w = w * out_scale[None, None, :]
    return w.astype(_MM_DTYPE)


def prepare_params(raw):
    """One-time conversion to kernel-ready layouts (transposes / BN folds / bf16)."""
    f32 = jnp.float32
    out = {}

    il = raw["input_layer"]
    s, b = _fold_bn(il["bn"])                         # BN after conv: exact fold
    out["input_layer"] = {
        "w9": _conv_taps(il["w"], s),
        "bias": b.astype(f32).reshape(1, -1),
        "alpha": il["prelu"].astype(f32).reshape(1, -1),
    }

    body, strides = [], []
    for blk in raw["body"]:
        stride = blk["stride"]
        strides.append(stride)
        s1, b1 = _fold_bn(blk["res_bn1"])             # BN before conv: kept as exact affine
        s2, b2 = _fold_bn(blk["res_bn2"])             # BN after conv: exact fold
        q = {
            "bn1_scale": s1.astype(f32),
            "bn1_shift": b1.astype(f32),
            "res_w1": _conv_taps(blk["res_w1"]),
            "alpha": blk["prelu"].astype(f32).reshape(1, -1),
            "bn2_shift": b2.astype(f32).reshape(1, -1),
        }
        w2 = _conv_taps(blk["res_w2"], s2)
        if stride == 1:
            q["res_w2"] = w2
        else:
            q["res_w2_mat"] = w2.reshape(-1, w2.shape[-1])     # matches im2col layout
        if blk["in_c"] != blk["depth"]:
            ss, sb = _fold_bn(blk["shortcut_bn"])
            w = blk["shortcut_w"][:, :, 0, 0]                  # (O, I)
            q["shortcut_w"] = (jnp.transpose(w, (1, 0)) * ss[None, :]).astype(_MM_DTYPE)
            q["shortcut_b"] = sb.astype(f32).reshape(1, -1)
        body.append(q)
    out["body"] = body

    ol = raw["output_layer_2"]
    s, b = _fold_bn(ol["bn"])
    # nn.Linear consumes the NCHW flatten (c*49 + h*7 + w); permute its columns once
    # so it consumes the NHWC flatten ((h*7 + w)*512 + c) produced by the forward.
    fcw = ol["fc_w"].reshape(512, 512, 7, 7)
    fcw = jnp.transpose(fcw, (2, 3, 1, 0)).reshape(512 * 7 * 7, 512)
    out["output_layer_2"] = {
        "bn_scale": s.astype(f32).reshape(1, -1),
        "bn_shift": b.astype(f32).reshape(1, -1),
        "fc_w": fcw.astype(_MM_DTYPE),
        "fc_b": ol["fc_b"].astype(f32).reshape(1, -1),
    }

    lin = raw["linear"]
    scale = (1.0 / math.sqrt(512.0)) * lin["lr_mul"]
    out["linear"] = {
        "w": (jnp.transpose(lin["w"], (1, 0)) * scale).astype(_MM_DTYPE),
        "b": (lin["b"] * lin["lr_mul"]).astype(f32).reshape(1, -1),
    }
    return out, tuple(strides)


if __name__ == "__main__":
    batch, input_nc, spatial, n_styles = 2, 3, 16, 4
    kg = KeyGen(0)
    raw = init_raw_params(kg, input_nc=input_nc, n_styles=n_styles, num_layers=50)
    params, block_strides = prepare_params(raw)
    x = jax.random.normal(jax.random.PRNGKey(0),
                          (batch, input_nc, spatial, spatial), jnp.float32)
    out = encoder_forward(x, params, block_strides, n_styles)
    out = jax.block_until_ready(out)
    assert out.shape == (batch, n_styles, 512), out.shape
    assert bool(jnp.all(jnp.isfinite(out)))
    print("KERNEL_OK")
</pallas_src>

<mosaic_0001>
module attributes {stable_mosaic.version = 11 : i64} {
  func.func @_conv3x3_kernel(%arg0: i32, %arg1: i32, %arg2: memref<1x16x18x3xbf16, #tpu.memory_space<vmem>>, %arg3: memref<1x1x18x3xbf16, #tpu.memory_space<vmem>>, %arg4: memref<1x1x18x3xbf16, #tpu.memory_space<vmem>>, %arg5: memref<9x3x64xbf16, #tpu.memory_space<vmem>>, %arg6: memref<1x64xf32, #tpu.memory_space<vmem>>, %arg7: memref<1x64xf32, #tpu.memory_space<vmem>>, %arg8: memref<1x16x16x64xbf16, #tpu.memory_space<vmem>>) attributes {dimension_semantics = [#tpu.dimension_semantics<parallel>, #tpu.dimension_semantics<parallel>], iteration_bounds = array<i64: 2, 1>, scalar_prefetch = 0 : i64, scratch_operands = 0 : i64, tpu.core_type = #tpu.core_type<tc>, window_params = [{transform_indices = @transform_0, window_bounds = array<i64: 1, 16, 18, 3>}, {transform_indices = @transform_1, window_bounds = array<i64: 1, 1, 18, 3>}, {transform_indices = @transform_2, window_bounds = array<i64: 1, 1, 18, 3>}, {pipeline_mode = #tpu.pipeline_mode<synchronous>, transform_indices = @transform_3, window_bounds = array<i64: 9, 3, 64>}, {pipeline_mode = #tpu.pipeline_mode<synchronous>, transform_indices = @transform_4, window_bounds = array<i64: 1, 64>}, {pipeline_mode = #tpu.pipeline_mode<synchronous>, transform_indices = @transform_5, window_bounds = array<i64: 1, 64>}, {transform_indices = @transform_6, window_bounds = array<i64: 1, 16, 16, 64>}]} {
    %c0 = arith.constant 0 : index
    %c0_0 = arith.constant 0 : index
    %c0_1 = arith.constant 0 : index
    %c0_2 = arith.constant 0 : index
    %0 = vector.load %arg2[%c0, %c0_0, %c0_1, %c0_2] : memref<1x16x18x3xbf16, #tpu.memory_space<vmem>>, vector<1x16x18x3xbf16>
    %1 = vector.shape_cast %0 : vector<1x16x18x3xbf16> to vector<16x18x3xbf16>
    %c0_3 = arith.constant 0 : index
    %c0_4 = arith.constant 0 : index
    %c0_5 = arith.constant 0 : index
    %c0_6 = arith.constant 0 : index
    %2 = vector.load %arg3[%c0_3, %c0_4, %c0_5, %c0_6] : memref<1x1x18x3xbf16, #tpu.memory_space<vmem>>, vector<1x1x18x3xbf16>
    %3 = vector.shape_cast %2 : vector<1x1x18x3xbf16> to vector<1x18x3xbf16>
    %c0_7 = arith.constant 0 : index
    %c0_8 = arith.constant 0 : index
    %c0_9 = arith.constant 0 : index
    %c0_10 = arith.constant 0 : index
    %4 = vector.load %arg4[%c0_7, %c0_8, %c0_9, %c0_10] : memref<1x1x18x3xbf16, #tpu.memory_space<vmem>>, vector<1x1x18x3xbf16>
    %5 = vector.shape_cast %4 : vector<1x1x18x3xbf16> to vector<1x18x3xbf16>
    %6 = tpu.concatenate %1, %3, %5 in 0 : vector<16x18x3xbf16>, vector<1x18x3xbf16>, vector<1x18x3xbf16> -> vector<18x18x3xbf16>
    %cst = arith.constant 0.000000e+00 : f32
    %7 = vector.broadcast %cst : f32 to vector<256x64xf32>
    %8 = vector.extract_strided_slice %6 {offsets = [0, 0, 0], sizes = [18, 16, 3], strides = [1, 1, 1]} : vector<18x18x3xbf16> to vector<18x16x3xbf16>
    %9 = vector.extract_strided_slice %8 {offsets = [0, 0, 0], sizes = [16, 16, 3], strides = [1, 1, 1]} : vector<18x16x3xbf16> to vector<16x16x3xbf16>
    %10 = vector.shape_cast %9 : vector<16x16x3xbf16> to vector<256x3xbf16>
    %c0_11 = arith.constant 0 : index
    %c0_12 = arith.constant 0 : index
    %c0_13 = arith.constant 0 : index
    %11 = vector.load %arg5[%c0_11, %c0_12, %c0_13] : memref<9x3x64xbf16, #tpu.memory_space<vmem>>, vector<1x3x64xbf16>
    %12 = vector.shape_cast %11 : vector<1x3x64xbf16> to vector<3x64xbf16>
    %cst_14 = arith.constant dense<0.000000e+00> : vector<256x64xf32>
    %13 = tpu.matmul %10, %12, %cst_14 {dimension_numbers = #tpu.dot_dimension_numbers<[1], [0], [0], [1], [0, 0, 1, 1], [], []>} : vector<256x3xbf16>, vector<3x64xbf16>, vector<256x64xf32> -> vector<256x64xf32>
    %14 = arith.addf %7, %13 : vector<256x64xf32>
    %15 = vector.extract_strided_slice %8 {offsets = [1, 0, 0], sizes = [16, 16, 3], strides = [1, 1, 1]} : vector<18x16x3xbf16> to vector<16x16x3xbf16>
    %16 = vector.shape_cast %15 : vector<16x16x3xbf16> to vector<256x3xbf16>
    %c3 = arith.constant 3 : index
    %c0_15 = arith.constant 0 : index
    %c0_16 = arith.constant 0 : index
    %17 = vector.load %arg5[%c3, %c0_15, %c0_16] : memref<9x3x64xbf16, #tpu.memory_space<vmem>>, vector<1x3x64xbf16>
    %18 = vector.shape_cast %17 : vector<1x3x64xbf16> to vector<3x64xbf16>
    %cst_17 = arith.constant dense<0.000000e+00> : vector<256x64xf32>
    %19 = tpu.matmul %16, %18, %cst_17 {dimension_numbers = #tpu.dot_dimension_numbers<[1], [0], [0], [1], [0, 0, 1, 1], [], []>} : vector<256x3xbf16>, vector<3x64xbf16>, vector<256x64xf32> -> vector<256x64xf32>
    %20 = arith.addf %14, %19 : vector<256x64xf32>
    %21 = vector.extract_strided_slice %8 {offsets = [2, 0, 0], sizes = [16, 16, 3], strides = [1, 1, 1]} : vector<18x16x3xbf16> to vector<16x16x3xbf16>
    %22 = vector.shape_cast %21 : vector<16x16x3xbf16> to vector<256x3xbf16>
    %c6 = arith.constant 6 : index
    %c0_18 = arith.constant 0 : index
    %c0_19 = arith.constant 0 : index
    %23 = vector.load %arg5[%c6, %c0_18, %c0_19] : memref<9x3x64xbf16, #tpu.memory_space<vmem>>, vector<1x3x64xbf16>
    %24 = vector.shape_cast %23 : vector<1x3x64xbf16> to vector<3x64xbf16>
    %cst_20 = arith.constant dense<0.000000e+00> : vector<256x64xf32>
    %25 = tpu.matmul %22, %24, %cst_20 {dimension_numbers = #tpu.dot_dimension_numbers<[1], [0], [0], [1], [0, 0, 1, 1], [], []>} : vector<256x3xbf16>, vector<3x64xbf16>, vector<256x64xf32> -> vector<256x64xf32>
    %26 = arith.addf %20, %25 : vector<256x64xf32>
    %27 = vector.extract_strided_slice %6 {offsets = [0, 1, 0], sizes = [18, 16, 3], strides = [1, 1, 1]} : vector<18x18x3xbf16> to vector<18x16x3xbf16>
    %28 = vector.extract_strided_slice %27 {offsets = [0, 0, 0], sizes = [16, 16, 3], strides = [1, 1, 1]} : vector<18x16x3xbf16> to vector<16x16x3xbf16>
    %29 = vector.shape_cast %28 : vector<16x16x3xbf16> to vector<256x3xbf16>
    %c1 = arith.constant 1 : index
    %c0_21 = arith.constant 0 : index
    %c0_22 = arith.constant 0 : index
    %30 = vector.load %arg5[%c1, %c0_21, %c0_22] : memref<9x3x64xbf16, #tpu.memory_space<vmem>>, vector<1x3x64xbf16>
    %31 = vector.shape_cast %30 : vector<1x3x64xbf16> to vector<3x64xbf16>
    %cst_23 = arith.constant dense<0.000000e+00> : vector<256x64xf32>
    %32 = tpu.matmul %29, %31, %cst_23 {dimension_numbers = #tpu.dot_dimension_numbers<[1], [0], [0], [1], [0, 0, 1, 1], [], []>} : vector<256x3xbf16>, vector<3x64xbf16>, vector<256x64xf32> -> vector<256x64xf32>
    %33 = arith.addf %26, %32 : vector<256x64xf32>
    %34 = vector.extract_strided_slice %27 {offsets = [1, 0, 0], sizes = [16, 16, 3], strides = [1, 1, 1]} : vector<18x16x3xbf16> to vector<16x16x3xbf16>
    %35 = vector.shape_cast %34 : vector<16x16x3xbf16> to vector<256x3xbf16>
    %c4 = arith.constant 4 : index
    %c0_24 = arith.constant 0 : index
    %c0_25 = arith.constant 0 : index
    %36 = vector.load %arg5[%c4, %c0_24, %c0_25] : memref<9x3x64xbf16, #tpu.memory_space<vmem>>, vector<1x3x64xbf16>
    %37 = vector.shape_cast %36 : vector<1x3x64xbf16> to vector<3x64xbf16>
    %cst_26 = arith.constant dense<0.000000e+00> : vector<256x64xf32>
    %38 = tpu.matmul %35, %37, %cst_26 {dimension_numbers = #tpu.dot_dimension_numbers<[1], [0], [0], [1], [0, 0, 1, 1], [], []>} : vector<256x3xbf16>, vector<3x64xbf16>, vector<256x64xf32> -> vector<256x64xf32>
    %39 = arith.addf %33, %38 : vector<256x64xf32>
    %40 = vector.extract_strided_slice %27 {offsets = [2, 0, 0], sizes = [16, 16, 3], strides = [1, 1, 1]} : vector<18x16x3xbf16> to vector<16x16x3xbf16>
    %41 = vector.shape_cast %40 : vector<16x16x3xbf16> to vector<256x3xbf16>
    %c7 = arith.constant 7 : index
    %c0_27 = arith.constant 0 : index
    %c0_28 = arith.constant 0 : index
    %42 = vector.load %arg5[%c7, %c0_27, %c0_28] : memref<9x3x64xbf16, #tpu.memory_space<vmem>>, vector<1x3x64xbf16>
    %43 = vector.shape_cast %42 : vector<1x3x64xbf16> to vector<3x64xbf16>
    %cst_29 = arith.constant dense<0.000000e+00> : vector<256x64xf32>
    %44 = tpu.matmul %41, %43, %cst_29 {dimension_numbers = #tpu.dot_dimension_numbers<[1], [0], [0], [1], [0, 0, 1, 1], [], []>} : vector<256x3xbf16>, vector<3x64xbf16>, vector<256x64xf32> -> vector<256x64xf32>
    %45 = arith.addf %39, %44 : vector<256x64xf32>
    %46 = vector.extract_strided_slice %6 {offsets = [0, 2, 0], sizes = [18, 16, 3], strides = [1, 1, 1]} : vector<18x18x3xbf16> to vector<18x16x3xbf16>
    %47 = vector.extract_strided_slice %46 {offsets = [0, 0, 0], sizes = [16, 16, 3], strides = [1, 1, 1]} : vector<18x16x3xbf16> to vector<16x16x3xbf16>
    %48 = vector.shape_cast %47 : vector<16x16x3xbf16> to vector<256x3xbf16>
    %c2 = arith.constant 2 : index
    %c0_30 = arith.constant 0 : index
    %c0_31 = arith.constant 0 : index
    %49 = vector.load %arg5[%c2, %c0_30, %c0_31] : memref<9x3x64xbf16, #tpu.memory_space<vmem>>, vector<1x3x64xbf16>
    %50 = vector.shape_cast %49 : vector<1x3x64xbf16> to vector<3x64xbf16>
    %cst_32 = arith.constant dense<0.000000e+00> : vector<256x64xf32>
    %51 = tpu.matmul %48, %50, %cst_32 {dimension_numbers = #tpu.dot_dimension_numbers<[1], [0], [0], [1], [0, 0, 1, 1], [], []>} : vector<256x3xbf16>, vector<3x64xbf16>, vector<256x64xf32> -> vector<256x64xf32>
    %52 = arith.addf %45, %51 : vector<256x64xf32>
    %53 = vector.extract_strided_slice %46 {offsets = [1, 0, 0], sizes = [16, 16, 3], strides = [1, 1, 1]} : vector<18x16x3xbf16> to vector<16x16x3xbf16>
    %54 = vector.shape_cast %53 : vector<16x16x3xbf16> to vector<256x3xbf16>
    %c5 = arith.constant 5 : index
    %c0_33 = arith.constant 0 : index
    %c0_34 = arith.constant 0 : index
    %55 = vector.load %arg5[%c5, %c0_33, %c0_34] : memref<9x3x64xbf16, #tpu.memory_space<vmem>>, vector<1x3x64xbf16>
    %56 = vector.shape_cast %55 : vector<1x3x64xbf16> to vector<3x64xbf16>
    %cst_35 = arith.constant dense<0.000000e+00> : vector<256x64xf32>
    %57 = tpu.matmul %54, %56, %cst_35 {dimension_numbers = #tpu.dot_dimension_numbers<[1], [0], [0], [1], [0, 0, 1, 1], [], []>} : vector<256x3xbf16>, vector<3x64xbf16>, vector<256x64xf32> -> vector<256x64xf32>
    %58 = arith.addf %52, %57 : vector<256x64xf32>
    %59 = vector.extract_strided_slice %46 {offsets = [2, 0, 0], sizes = [16, 16, 3], strides = [1, 1, 1]} : vector<18x16x3xbf16> to vector<16x16x3xbf16>
    %60 = vector.shape_cast %59 : vector<16x16x3xbf16> to vector<256x3xbf16>
    %c8 = arith.constant 8 : index
    %c0_36 = arith.constant 0 : index
    %c0_37 = arith.constant 0 : index
    %61 = vector.load %arg5[%c8, %c0_36, %c0_37] : memref<9x3x64xbf16, #tpu.memory_space<vmem>>, vector<1x3x64xbf16>
    %62 = vector.shape_cast %61 : vector<1x3x64xbf16> to vector<3x64xbf16>
    %cst_38 = arith.constant dense<0.000000e+00> : vector<256x64xf32>
    %63 = tpu.matmul %60, %62, %cst_38 {dimension_numbers = #tpu.dot_dimension_numbers<[1], [0], [0], [1], [0, 0, 1, 1], [], []>} : vector<256x3xbf16>, vector<3x64xbf16>, vector<256x64xf32> -> vector<256x64xf32>
    %64 = arith.addf %58, %63 : vector<256x64xf32>
    %c0_39 = arith.constant 0 : index
    %c0_40 = arith.constant 0 : index
    %65 = vector.load %arg6[%c0_39, %c0_40] : memref<1x64xf32, #tpu.memory_space<vmem>>, vector<1x64xf32>
    %66 = vector.broadcast %65 : vector<1x64xf32> to vector<256x64xf32>
    %67 = arith.addf %64, %66 : vector<256x64xf32>
    %cst_41 = arith.constant 0.000000e+00 : f32
    %68 = vector.broadcast %cst_41 : f32 to vector<256x64xf32>
    %69 = arith.cmpf oge, %67, %68 : vector<256x64xf32>
    %c0_42 = arith.constant 0 : index
    %c0_43 = arith.constant 0 : index
    %70 = vector.load %arg7[%c0_42, %c0_43] : memref<1x64xf32, #tpu.memory_space<vmem>>, vector<1x64xf32>
    %71 = vector.broadcast %70 : vector<1x64xf32> to vector<256x64xf32>
    %72 = arith.mulf %67, %71 : vector<256x64xf32>
    %73 = arith.select %69, %67, %72 : vector<256x64xi1>, vector<256x64xf32>
    %74 = vector.shape_cast %73 : vector<256x64xf32> to vector<16x16x64xf32>
    %75 = arith.truncf %74 : vector<16x16x64xf32> to vector<16x16x64xbf16>
    %c0_44 = arith.constant 0 : index
    %c0_45 = arith.constant 0 : index
    %c0_46 = arith.constant 0 : index
    %c0_47 = arith.constant 0 : index
    %76 = vector.load %arg8[%c0_44, %c0_45, %c0_46, %c0_47] : memref<1x16x16x64xbf16, #tpu.memory_space<vmem>>, vector<1x16x16x64xbf16>
    %77 = vector.shape_cast %76 : vector<1x16x16x64xbf16> to vector<16x16x64xbf16>
    %78 = vector.shape_cast %75 : vector<16x16x64xbf16> to vector<1x16x16x64xbf16>
    tpu.vector_store %arg8[%c0_44, %c0_45, %c0_46, %c0_47], %78 {strides = array<i32>} : memref<1x16x16x64xbf16, #tpu.memory_space<vmem>>, vector<1x16x16x64xbf16>,
    return
  }
  func.func @transform_0(%arg0: i32, %arg1: i32) -> (i32, i32, i32, i32) {
    %c0_i32 = arith.constant 0 : i32
    %c0_i32_0 = arith.constant 0 : i32
    %c0_i32_1 = arith.constant 0 : i32
    return %arg0, %arg1, %c0_i32, %c0_i32_0 : i32, i32, i32, i32
  }
  func.func @transform_1(%arg0: i32, %arg1: i32) -> (i32, i32, i32, i32) {
    %c16_i32 = arith.constant 16 : i32
    %0 = arith.muli %arg1, %c16_i32 : i32
    %c16_i32_0 = arith.constant 16 : i32
    %1 = arith.addi %0, %c16_i32_0 : i32
    %c0_i32 = arith.constant 0 : i32
    %c0_i32_1 = arith.constant 0 : i32
    %c0_i32_2 = arith.constant 0 : i32
    return %arg0, %1, %c0_i32, %c0_i32_1 : i32, i32, i32, i32
  }
  func.func @transform_2(%arg0: i32, %arg1: i32) -> (i32, i32, i32, i32) {
    %c16_i32 = arith.constant 16 : i32
    %0 = arith.muli %arg1, %c16_i32 : i32
    %c16_i32_0 = arith.constant 16 : i32
    %1 = arith.addi %0, %c16_i32_0 : i32
    %c1_i32 = arith.constant 1 : i32
    %2 = arith.addi %1, %c1_i32 : i32
    %c0_i32 = arith.constant 0 : i32
    %c0_i32_1 = arith.constant 0 : i32
    %c0_i32_2 = arith.constant 0 : i32
    return %arg0, %2, %c0_i32, %c0_i32_1 : i32, i32, i32, i32
  }
  func.func @transform_3(%arg0: i32, %arg1: i32) -> (i32, i32, i32) {
    %c0_i32 = arith.constant 0 : i32
    %c0_i32_0 = arith.constant 0 : i32
    %c0_i32_1 = arith.constant 0 : i32
    %c0_i32_2 = arith.constant 0 : i32
    return %c0_i32, %c0_i32_0, %c0_i32_1 : i32, i32, i32
  }
  func.func @transform_4(%arg0: i32, %arg1: i32) -> (i32, i32) {
    %c0_i32 = arith.constant 0 : i32
    %c0_i32_0 = arith.constant 0 : i32
    %c0_i32_1 = arith.constant 0 : i32
    return %c0_i32, %c0_i32_0 : i32, i32
  }
  func.func @transform_5(%arg0: i32, %arg1: i32) -> (i32, i32) {
    %c0_i32 = arith.constant 0 : i32
    %c0_i32_0 = arith.constant 0 : i32
    %c0_i32_1 = arith.constant 0 : i32
    return %c0_i32, %c0_i32_0 : i32, i32
  }
  func.func @transform_6(%arg0: i32, %arg1: i32) -> (i32, i32, i32, i32) {
    %c0_i32 = arith.constant 0 : i32
    %c0_i32_0 = arith.constant 0 : i32
    %c0_i32_1 = arith.constant 0 : i32
    return %arg0, %arg1, %c0_i32, %c0_i32_0 : i32, i32, i32, i32
  }
}

</mosaic_0001>

<bundles_post_ra>
// kernel: conv3x3_s1.1
= control target key start
LH: loop header
LB: loop body
LE: loop exit
PB: predicated region body
PF: predicated region fallthrough
CT: control target
= control target key end

     0   :  { %11 = vsyncpa [#allocation3], 0  ;;  %s6327_s0 = inlined_call_operand.vmem [shape: bf16[2,18,18,3], index: 0, kind: input, shape index: {}, may-alias: {0,1,2}]   ;;  %s6328_s1 = inlined_call_operand.vmem [shape: bf16[2,18,18,3], index: 1, kind: input, shape index: {}, may-alias: {0,1,2}]   ;;  %s6329_s2 = inlined_call_operand.vmem [shape: bf16[2,18,18,3], index: 2, kind: input, shape index: {}, may-alias: {0,1,2}]   ;;  %s6330_s3 = inlined_call_operand.vmem [shape: bf16[9,3,64], index: 3, kind: input, shape index: {}]   ;;  %s6331_s4 = inlined_call_operand.vmem [shape: f32[1,64], index: 4, kind: input, shape index: {}]   ;;  %s6332_s5 = inlined_call_operand.vmem [shape: f32[1,64], index: 5, kind: input, shape index: {}]   ;;  %s6333_s6 = inlined_call_operand.hbm [shape: bf16[2,16,16,64], index: 6, kind: output, shape index: {}]  }
   0x1   :  { %13 = vsyncpa [#allocation3 + $0x1], 0  ;;  %s4548_s21 = smov 0   ;;  %s4550_s22 = smov 0  }
   0x2   :  { %s4552_s23 = smov 0   ;;  %s4554_s24 = smov 0  }
   0x3   :  { %s4556_s25 = smov 0   ;;  %s4558_s26 = smov 0  }
   0x4 LB: > { %s3568_s27 = sadd.s32 4294967295, %s4507_s26   ;;  %s3569_s28 = sadd.s32 4294967294, %s4507_s26   ;;  %s4507_s26 = sphi %s4558_s26, %s19_s26   ;;  %s4503_s25 = sphi %s4556_s25, %s6495_s25   ;;  %s4499_s24 = sphi %s4554_s24, %s6494_s24   ;;  %s4495_s23 = sphi %s4552_s23, %s6493_s23   ;;  %s4491_s22 = sphi %s4550_s22, %s6492_s22   ;;  %s4487_s21 = sphi %s4548_s21, %s6491_s21  }
   0x5   : > { %s31_s29 = sadd.s32 1, %s4503_s25  ;;  %s195_s30 = sadd.s32 1, %s4495_s23 }
   0x6   : > { %p33_p0 = scmp.ge.s32.totalorder %s31_s29, 2  ;;  %p205_p1 = scmp.ne.s32.totalorder %s4495_s23, %s4491_s22 }
   0x7   : > { %p206_p2 = scmp.eq.s32.totalorder %s3568_s27, 1  ;;  %p211_p3 = scmp.ne.s32.totalorder %s4491_s22, %s4487_s21 }
   0x8   : > { %s6497_s29 = smov (%p33_p0, %s31_s29), 0  ;;  %p212_p5 = scmp.eq.s32.totalorder %s3569_s28, 1 }
   0x9   : > { %p4588_p4 = por %p206_p2, %p205_p1  ;;  %s190_s8 = ssub.s32 %s4503_s25, %s6497_s29 }
   0xa   : > { %p3572_p6 = scmp.ge.s32.totalorder %s4507_s26, 1  ;;  %p193_p7 = scmp.eq.s32.totalorder %s190_s8, 0 }
   0xb   : > { %p4595_p8 = por %p212_p5, %p211_p3  ;;  %p295_p9 = scmp.lt.s32.totalorder %s4507_s26, 3 }
   0xc   : > { %s4601_s10 = scalar_select %p193_p7, %s4495_s23, %s195_s30  }
   0xd   : > { %p296_p10 = pnand %p3572_p6, %p295_p9 }
   0xf   : > { %299 = sbr.rel (%p296_p10) target bundleno = 539 (0x21b), region = 44 }
  0x14   : > { %v3577_v0 = vld [vmem:[%s6330_s3 + $0x6] sm:$0x3]  ;;  %vm592_vm0 = vcmask 1040384   ;;  %vm593_vm1 = vcmask 1041408   ;;  %p363_p11 = scmp.lt.s32.totalorder %s4499_s24, 1  ;;  %v4509_v1 = vmov 65535  }
  0x15   : > { %v594_v2 = vsel %vm592_vm0, 4294967295, %v4509_v1  ;;  %v460_v3 = vld [vmem:[%s6330_s3] sm:$0x3]  ;;  %v3627_v5 = vld [vmem:[%s6330_s3 + $0xc] sm:$0x3]  ;;  %vm2291_vm2 = vcmask 1042432  }
  0x16   : > { %v4610_v4 = vsel %vm593_vm1, %v594_v2, 0  ;;  %s364_s15 = scalar_select %p363_p11, %s4499_s24, 1  ;;  %vm2292_vm3 = vcmask 1046532   ;;  %vm543_vm4 = vcmask 23552   ;;  %v3678_v23 = vld [vmem:[%s6330_s3 + $0x8] sm:$0x3] }
  0x17   : > { %v597_v6 = vand.u32 %v3577_v0, %v4610_v4  ;;  %v769_v7 = vand.u32 %v4610_v4, %v460_v3  ;;  %v943_v8 = vand.u32 %v3627_v5, %v4610_v4  ;;  %vm4637_vm5 = vmor %vm2291_vm2, %vm2292_vm3  ;;  %v3645_v26 = vld [vmem:[%s6330_s3 + $0x2] sm:$0x3]  ;;  %v4682_v30 = vand.u32 %v3678_v23, %v4610_v4  ;;  %s354_s16 = sand.u32 1, %s4491_s22   ;;  %s4510_s14 = smov [#allocation2]  }
  0x18   : > { %s4619_s18 = smul.u32 216, %s364_s15  ;;  %v4703_v36 = vand.u32 %v3645_v26, %v4610_v4  ;;  %vm1138_vm6 = vsmask.f32 3328  ;;  %vm1139_vm7 = vsmask.f32 7440  ;;  %vm3394_vm9 = vcmask 519168  }
  0x19   : > { %4336 = vmatprep.subr.bf16.mxu1 %v597_v6  ;;  %4030 = vmatprep.subr.bf16.mxu0 %v597_v6  ;;  %vm4759_vm8 = vmor %vm1138_vm6, %vm1139_vm7  ;;  %s3573_s20 = sshll.u32 %s354_s16, 7 }
  0x1a   : > { %4337 = vmatpush3.bf16.msra.mxu1 %v597_v6  ;;  %4031 = vmatpush3.bf16.msra.mxu0 %v597_v6  ;;  %s4625_s27 = scalar_lea.vmem %s6327_s0, %s4619_s18  ;;  %s3841_s12 = sadd.s32 192, %s4619_s18 }
  0x1b   : > { %v409_v9 = vld [vmem:[%s4625_s27 + $0xc] sm:$0xf]  ;;  %v4629_v10 = vld [vmem:[%s4625_s27 + $0x10] sm:$0xf]  ;;  %4064 = vmatprep.subr.bf16.mxu1 %v769_v7  ;;  %4098 = vmatprep.subr.bf16.mxu0 %v943_v8  ;;  %v4660_v21 = vld [vmem:[%s4625_s27 + $0x18] sm:$0xf]  ;;  %s4824_s15 = scalar_lea.vmem %s6328_s1, %s3841_s12 }
  0x1c   : > { %v4632_v11 = vld [vmem:[%s4625_s27 + $0x6c] sm:$0xf]  ;;  %v4635_v12 = vcombine.low %v409_v9, %v4629_v10  ;;  %v4642_v14 = vld [vmem:[%s4625_s27 + $0x70] sm:$0xf]  ;;  %v3715_v15 = vrot.slane %v409_v9, 9  ;;  %v6334_v16 = vrot.slane %v4629_v10, 5 }
  0x1d   : > { %v4647_v17 = vcombine.low %v4632_v11, %v4642_v14  ;;  %v1166_v18 = vshrl.u32 %v409_v9, 16  ;;  %v1169_v19 = vshll.u32 %v409_v9, 16  ;;  %6362 = vst [vmem:[#allocation5_spill] sm:$0xff] %v4660_v21  ;;  %v4663_v22 = vld [vmem:[%s4625_s27 + $0x1c] sm:$0xf]  ;;  %v1175_v44 = vshll.u32 %v4629_v10, 16 }
  0x1e   : > { %4032 = vmatprep.mubr.msk.bf16.mxu0 %vm543_vm4, %v4635_v12  ;;  %v4655_v20 = vsel %vm4637_vm5, %v3715_v15, %v6334_v16  ;;  %6363 = vst [vmem:[#allocation6_spill] sm:$0xff] %v4663_v22  ;;  %v4669_v24 = vld [vmem:[%s4625_s27 + $0x78] sm:$0xf]  ;;  %v4672_v25 = vld [vmem:[%s4625_s27 + $0x7c] sm:$0xf]  ;;  %v4679_v29 = vcombine.low %v4660_v21, %v4663_v22  ;;  %v1179_v56 = vshrl.u32 %v4629_v10, 16 }
  0x1f   : > { %4048 = vmatprep.mubr.msk.bf16.mxu1 %vm543_vm4, %v4647_v17  ;;  %v1168_v27 = vrot.slane %v1166_v18, 4  ;;  %v1171_v28 = vrot.slane %v1169_v19, 5  ;;  %v4685_v31 = vld [vmem:[%s4625_s27 + $0x24] sm:$0xf]  ;;  %v4688_v32 = vld [vmem:[%s4625_s27 + $0x28] sm:$0xf]  ;;  %v4694_v33 = vcombine.low %v4669_v24, %v4672_v25 }
  0x20   : > { %6364 = vst [vmem:[#allocation7_spill] sm:$0xff] %v4685_v31  ;;  %6365 = vst [vmem:[#allocation8_spill] sm:$0xff] %v4688_v32  ;;  %4033 = vmatmul.mubr.msk.bf16.vlgmr.msra.gmra.mxu0 %vm543_vm4, %v4679_v29  ;;  %v4697_v34 = vld [vmem:[%s4625_s27 + $0x84] sm:$0xf]  ;;  %v4700_v35 = vld [vmem:[%s4625_s27 + $0x88] sm:$0xf]  ;;  %v4712_v39 = vcombine.low %v4685_v31, %v4688_v32 }
  0x21   : > { %4099 = vmatpush3.bf16.msra.mxu0 %v943_v8  ;;  %v4706_v37 = vld [vmem:[%s4625_s27 + $0x30] sm:$0xf]  ;;  %v1172_v38 = vor.u32 %v1171_v28, %v1168_v27  ;;  %4049 = vmatmul.mubr.msk.bf16.vlgmr.msra.gmra.mxu1 %vm543_vm4, %v4694_v33  ;;  %v4715_v40 = vld [vmem:[%s4625_s27 + $0x34] sm:$0xf]  ;;  %v4720_v41 = vcombine.low %v4697_v34, %v4700_v35  ;;  %v4736_v46 = vld [vmem:[%s4625_s27 + $0x3c] sm:$0xf] }
  0x22   : > { %6366 = vst [vmem:[#allocation9_spill] sm:$0xff] %v4706_v37  ;;  %6367 = vst [vmem:[#allocation10_spill] sm:$0xff] %v4715_v40  ;;  %4166 = vmatprep.subr.bf16.mxu0 %v4682_v30  ;;  %4065 = vmatpush3.bf16.msra.mxu1 %v769_v7  ;;  %v4723_v42 = vld [vmem:[%s4625_s27 + $0x90] sm:$0xf]  ;;  %v4726_v43 = vld [vmem:[%s4625_s27 + $0x94] sm:$0xf]  ;;  %v4733_v45 = vcombine.low %v4706_v37, %v4715_v40 }
  0x23   : > { %4036 = vmatprep.mubr.msk.bf16.mxu0 %vm543_vm4, %v4712_v39  ;;  %6368 = vst [vmem:[#allocation11_spill] sm:$0xff] %v4736_v46  ;;  %v4739_v47 = vld [vmem:[%s4625_s27 + $0x40] sm:$0xf]  ;;  %4132 = vmatprep.subr.bf16.mxu1 %v4703_v36  ;;  %v4745_v48 = vld [vmem:[%s4625_s27 + $0x9c] sm:$0xf]  ;;  %v1173_v49 = vrot.slane %v1172_v38, 4  ;;  %v4749_v50 = vcombine.low %v4723_v42, %v4726_v43 }
  0x24   : > { %6369 = vst [vmem:[#allocation12_spill] sm:$0xff] %v4739_v47  ;;  %4052 = vmatprep.mubr.msk.bf16.mxu1 %vm543_vm4, %v4720_v41  ;;  %v4752_v51 = vld [vmem:[%s4625_s27 + $0xa0] sm:$0xf]  ;;  %v4756_v52 = vcombine.low %v4736_v46, %v4739_v47  ;;  %v1177_v54 = vrot.slane %v1175_v44, 5  ;;  %v4773_v57 = vld [vmem:[%s4625_s27 + $0x48] sm:$0xf] }
  0x25   : > { %v4767_v55 = vcombine.low %v4745_v48, %v4752_v51  ;;  %v4776_v58 = vld [vmem:[%s4625_s27 + $0x4c] sm:$0xf]  ;;  %v4781_v59 = vld [vmem:[%s4625_s27 + $0xa8] sm:$0xf]  ;;  %v4791_v62 = vld [vmem:[%s4625_s27 + $0x54] sm:$0xf] }
  0x26   : > { %v1178_v60 = vsel %vm4759_vm8, %v1173_v49, %v1177_v54  ;;  %v4788_v61 = vld [vmem:[%s4625_s27 + $0xac] sm:$0xf]  ;;  %6372 = vst [vmem:[#allocation13_spill] sm:$0xff] %v4791_v62  ;;  %v4794_v63 = vld [vmem:[%s4625_s27 + $0x58] sm:$0xf]  ;;  %v4798_v0 = vcombine.low %v4773_v57, %v4776_v58  ;;  %v1181_v2 = vrot.slane %v1179_v56, 4 }
  0x27   : > { %v4801_v1 = vld [vmem:[%s4625_s27 + $0xb4] sm:$0xf]  ;;  %v4805_v3 = vcombine.low %v4791_v62, %v4794_v63  ;;  %v4808_v5 = vld [vmem:[%s4625_s27 + $0xb8] sm:$0xf]  ;;  %v4813_v6 = vcombine.low %v4781_v59, %v4788_v61  ;;  %v4829_v9 = vld [vmem:[%s4625_s27 + $0x60] sm:$0xf] }
  0x28   : > { %4037 = vmatmul.mubr.msk.bf16.gmra.mxu0 %vm543_vm4, %v4733_v45  ;;  %6373 = vst [vmem:[#allocation14_spill] sm:$0xff] %v4801_v1  ;;  %6374 = vst [vmem:[#allocation15_spill] sm:$0xff] %v4808_v5  ;;  %v4817_v7 = vcombine.low %v4801_v1, %v4808_v5  ;;  %v1182_v8 = vor.u32 %v1181_v2, %v1177_v54  ;;  %v4832_v15 = vld [vmem:[%s4625_s27 + $0x64] sm:$0xf]  ;;  %v4839_v18 = vld [vmem:[%s4824_s15] sm:$0xf] }
  0x29   : > { %4040 = vmatprep.mubr.msk.bf16.mxu0 %vm543_vm4, %v4756_v52  ;;  %4053 = vmatmul.mubr.msk.bf16.gmra.mxu1 %vm543_vm4, %v4749_v50  ;;  %6375 = vst [vmem:[#allocation16_spill] sm:$0xff] %v4839_v18  ;;  %v4842_v19 = vld [vmem:[%s4824_s15 + $0x4] sm:$0xf]  ;;  %v3585_v23 = vcombine.low %v4829_v9, %v4832_v15  ;;  %v4847_v26 = vld [vmem:[%s4625_s27] sm:$0xf]  ;;  %s3843_s28 = sadd.s32 204, %s4619_s18 }
  0x2a   : > { %4056 = vmatprep.mubr.msk.bf16.mxu1 %vm543_vm4, %v4767_v55  ;;  %6376 = vst [vmem:[#allocation17_spill] sm:$0xff] %v4842_v19  ;;  %v4850_v27 = vld [vmem:[%s4625_s27 + $0x4] sm:$0xf]  ;;  %v4853_v28 = vld [vmem:[%s4625_s27 + $0x14] sm:$0x1]  ;;  %v1183_v38 = vrot.slane %v1182_v8, 4  ;;  %v4858_v49 = vcombine.low %v4839_v18, %v4842_v19  ;;  %s5002_s8 = scalar_lea.vmem %s6329_s2, %s3843_s28 }
  0x2b   : > { %v1185_v44 = vshll.u32 %v4853_v28, 16  ;;  %v3610_v54 = vcombine.low %v4847_v26, %v4850_v27  ;;  %v3730_v16 = vld [vmem:[%s6330_s3 + $0x4] sm:$0x3]  ;;  %s6069_s28 = scalar_lea.vmem [#allocation2], %s3573_s20  ;;  %s3876_s18 = sshll.u32 %s4499_s24, 11 }
  0x2c   : > { %v4879_v19 = vand.u32 %v3730_v16, %v4610_v4  ;;  %s3444_s30 = sshll.u32 %s6069_s28, 4  ;;  %s6272_s12 = scalar_lea.hbm %s6333_s6, %s3876_s18  ;;  %s6274_s30 = int_to_ptr.vmem [resolvable:$true] %s3444_s30 }
  0x2d   : > { %v1187_v56 = vrot.slane %v1185_v44, 5  ;;  %v3696_v44 = vld [vmem:[%s6330_s3 + $0xe] sm:$0x3]  ;;  %s6282_s24 = scalar_lea.sflag [#allocation3], %s354_s16  ;;  %s4431_s13 = scalar_lea.vmem %s6274_s30, 2048 }
  0x2e   : > { %p4432_p12 = scmp.ne.s32.totalorder %s6274_s30, %s4431_s13 }
  0x2f   : > { %v1188_v2 = vsel %vm4759_vm8, %v1183_v38, %v1187_v56  ;;  %v1358_v38 = vshrl.u32 %v4632_v11, 16  ;;  %v1361_v56 = vshll.u32 %v4632_v11, 16 }
  0x30   : > { %4041 = vmatmul.mubr.msk.bf16.gmra.mxu0 %vm543_vm4, %v4798_v0  ;;  %v4869_v8 = vcombine.low %v1178_v60, %v1188_v2  ;;  %v1367_v60 = vshll.u32 %v4642_v14, 16  ;;  %v1371_v2 = vshrl.u32 %v4642_v14, 16  ;;  %p4433_p13 = pnand %p4432_p12, %p4588_p4 }
  0x31   : > { %4044 = vmatprep.mubr.msk.bf16.mxu0 %vm543_vm4, %v4805_v3  ;;  %4057 = vmatmul.mubr.msk.bf16.gmra.mxu1 %vm543_vm4, %v4813_v6  ;;  %v1360_v16 = vrot.slane %v1358_v38, 4  ;;  %v1363_v18 = vrot.slane %v1361_v56, 5 }
  0x32   : > { %4060 = vmatprep.mubr.msk.bf16.mxu1 %vm543_vm4, %v4817_v7  ;;  %v1373_v5 = vrot.slane %v1371_v2, 4  ;;  %p4434_p0 = pneg %p4433_p13 }
  0x38   : > { %4045 = vmatmul.mubr.msk.bf16.gmra.mxu0 %vm543_vm4, %v3585_v23 }
  0x39   : > { %4100 = vmatprep.mubr.msk.bf16.mxu0 %vm543_vm4, %v4679_v29  ;;  %4061 = vmatmul.mubr.msk.bf16.gmra.mxu1 %vm543_vm4, %v4858_v49 }
  0x3a   : > { %4066 = vmatprep.mubr.msk.bf16.mxu1 %vm543_vm4, %v3610_v54  ;;  %v4888_v54 = vand.u32 %v3696_v44, %v4610_v4  ;;  %v1369_v44 = vrot.slane %v1367_v60, 5  ;;  %v1203_v60 = vshrl.u32 %v4663_v22, 16 }
  0x3c   : > { %v1374_v1 = vor.u32 %v1373_v5, %v1369_v44 }
  0x40   : > { %4101 = vmatmul.mubr.msk.bf16.vlgmr.msra.gmra.mxu0 %vm543_vm4, %v4712_v39 }
  0x41   : > { %4167 = vmatpush3.bf16.msra.mxu0 %v4682_v30  ;;  %4104 = vmatprep.mubr.msk.bf16.mxu0 %vm543_vm4, %v4733_v45  ;;  %v1364_v30 = vor.u32 %v1363_v18, %v1360_v16 }
  0x42   : > { %4067 = vmatmul.mubr.msk.bf16.vlgmr.msra.gmra.mxu1 %vm543_vm4, %v4635_v12  ;;  %4234 = vmatprep.subr.bf16.mxu0 %v4879_v19  ;;  %v4905_v12 = vld [vmem:[%s4625_s27 + $0x74] sm:$0x1] }
  0x43   : > { %4133 = vmatpush3.bf16.msra.mxu1 %v4703_v36  ;;  %4070 = vmatprep.mubr.msk.bf16.mxu1 %vm543_vm4, %v4679_v29  ;;  %v1365_v29 = vrot.slane %v1364_v30, 4  ;;  %v1375_v36 = vrot.slane %v1374_v1, 4  ;;  %v1377_v38 = vshll.u32 %v4905_v12, 16  ;;  %v1193_v1 = vshll.u32 %v4660_v21, 16 }
  0x44   : > { %4200 = vmatprep.subr.bf16.mxu1 %v4888_v54  ;;  %v1142_v30 = vshrl.u32 %v4847_v26, 16 }
  0x45   : > { %v1370_v18 = vsel %vm4759_vm8, %v1365_v29, %v1369_v44  ;;  %v1379_v56 = vrot.slane %v1377_v38, 5  ;;  %v1195_v2 = vrot.slane %v1193_v1, 5  ;;  %v1205_v44 = vrot.slane %v1203_v60, 4  ;;  %v408_v1 = vld [vmem:[%s4625_s27 + $0x8] sm:$0x1] }
  0x46   : > { %v1145_v29 = vshll.u32 %v4847_v26, 16  ;;  %v2306_v38 = vrot.slane %v4853_v28, 5  ;;  %v1227_v60 = vshrl.u32 %v4688_v32, 16  ;;  %v2299_v28 = vrot.slane %v408_v1, 5 }
  0x47   : > { %v1380_v5 = vsel %vm4759_vm8, %v1375_v36, %v1379_v56  ;;  %v1155_v36 = vshrl.u32 %v4850_v27, 16 }
  0x48   : > { %4105 = vmatmul.mubr.msk.bf16.gmra.mxu0 %vm543_vm4, %v4756_v52 }
  0x49   : > { %4108 = vmatprep.mubr.msk.bf16.mxu0 %vm543_vm4, %v4798_v0 }
  0x4a   : > { %4071 = vmatmul.mubr.msk.bf16.gmra.mxu1 %vm543_vm4, %v4712_v39  ;;  %v4919_v39 = vcombine.low %v1370_v18, %v1380_v5  ;;  %v3714_v18 = vrot.slane %v4847_v26, 9 }
  0x4b   : > { %4074 = vmatprep.mubr.msk.bf16.mxu1 %vm543_vm4, %v4733_v45  ;;  %v1190_v45 = vshrl.u32 %v4660_v21, 16  ;;  %v1147_v21 = vrot.slane %v1145_v29, 5  ;;  %v1238_v29 = vshrl.u32 %v4706_v37, 16 }
  0x50   : > { %4109 = vmatmul.mubr.msk.bf16.gmra.mxu0 %vm543_vm4, %v4805_v3 }
  0x51   : > { %4112 = vmatprep.mubr.msk.bf16.mxu0 %vm543_vm4, %v3585_v23 }
  0x52   : > { %4075 = vmatmul.mubr.msk.bf16.gmra.mxu1 %vm543_vm4, %v4756_v52  ;;  %v1199_v52 = vshll.u32 %v4663_v22, 16  ;;  %v1157_v22 = vrot.slane %v1155_v36, 4  ;;  %v1241_v36 = vshll.u32 %v4706_v37, 16  ;;  %v5018_v37 = vld [vmem:[%s5002_s8] sm:$0xf] }
  0x53   : > { %4078 = vmatprep.mubr.msk.bf16.mxu1 %vm543_vm4, %v4798_v0  ;;  %v1192_v0 = vrot.slane %v1190_v45, 4  ;;  %v1217_v45 = vshll.u32 %v4685_v31, 16 }
  0x54   : > { %v4942_v16 = vrot.slane %v1199_v52, 5 }
  0x55   : > { %v1196_v5 = vor.u32 %v1195_v2, %v1192_v0  ;;  %v1223_v2 = vshll.u32 %v4688_v32, 16 }
  0x56   : > { %v1206_v52 = vor.u32 %v1205_v44, %v4942_v16 }
  0x58   : > { %4113 = vmatmul.mubr.msk.bf16.gmra.mxu0 %vm543_vm4, %v4647_v17 }
  0x59   : > { %4116 = vmatprep.mubr.msk.bf16.mxu0 %vm543_vm4, %v4694_v33 }
  0x5a   : > { %4079 = vmatmul.mubr.msk.bf16.gmra.mxu1 %vm543_vm4, %v4805_v3  ;;  %v6377_v3 = vrot.slane %v4629_v10, 5  ;;  %v1151_v10 = vshll.u32 %v4850_v27, 16 }
  0x5b   : > { %4082 = vmatprep.mubr.msk.bf16.mxu1 %vm543_vm4, %v3585_v23 }
  0x5c   : > { %v2305_v23 = vrot.slane %v6377_v3, 4  ;;  %v1144_v3 = vrot.slane %v1142_v30, 4  ;;  %v4965_v0 = vrot.slane %v1151_v10, 5  ;;  %v4973_v30 = vrot.slane %v1196_v5, 4 }
  0x5d   : > { %v1219_v10 = vrot.slane %v1217_v45, 5  ;;  %v4989_v5 = vrot.slane %v1206_v52, 4  ;;  %v5008_v45 = vrot.slane %v1223_v2, 5  ;;  %v1265_v52 = vshll.u32 %v4736_v46, 16  ;;  %v5021_v2 = vld [vmem:[%s5002_s8 + $0x4] sm:$0xf] }
  0x5e   : > { %v2307_v26 = vsel %vm4637_vm5, %v2305_v23, %v2306_v38 }
  0x5f   : > { %v4980_v23 = vcombine.low %v4655_v20, %v2307_v26  ;;  %v1148_v20 = vor.u32 %v1147_v21, %v1144_v3  ;;  %v4995_v26 = vld [vmem:[%s4625_s27 + $0x20] sm:$0x1]  ;;  %v1229_v21 = vrot.slane %v1227_v60, 4  ;;  %v1240_v3 = vrot.slane %v1238_v29, 4 }
  0x60   : > { %4117 = vmatmul.mubr.msk.bf16.gmra.mxu0 %vm543_vm4, %v4720_v41 }
  0x61   : > { %4120 = vmatprep.mubr.msk.bf16.mxu0 %vm543_vm4, %v4749_v50  ;;  %6379 = vst [vmem:[#allocation19_spill] sm:$0xff] %v4980_v23  ;;  %v1149_v60 = vrot.slane %v1148_v20, 4  ;;  %v1202_v23 = vsel %vm4759_vm8, %v4973_v30, %v4942_v16  ;;  %v3628_v16 = vcombine.low %v5018_v37, %v5021_v2 }
  0x62   : > { %4083 = vmatmul.mubr.msk.bf16.gmra.mxu1 %vm543_vm4, %v4647_v17  ;;  %v1214_v17 = vshrl.u32 %v4685_v31, 16 }
  0x63   : > { %4086 = vmatprep.mubr.msk.bf16.mxu1 %vm543_vm4, %v4694_v33  ;;  %v2296_v33 = vrot.slane %v4850_v27, 5  ;;  %v1230_v27 = vor.u32 %v1229_v21, %v5008_v45  ;;  %v1271_v21 = vshll.u32 %v4739_v47, 16 }
  0x64   : > { %v1216_v38 = vrot.slane %v1214_v17, 4  ;;  %v5006_v17 = vld [vmem:[%s4625_s27 + $0x2c] sm:$0x1] }
  0x65   : > { %v4970_v44 = vsel %vm4637_vm5, %v3714_v18, %v2296_v33  ;;  %v2298_v56 = vrot.slane %v2296_v33, 4  ;;  %v1251_v33 = vshrl.u32 %v4715_v40, 16  ;;  %6381 = vst [vmem:[#allocation21_spill] sm:$0xff] %v5006_v17  ;;  %v1233_v31 = vshll.u32 %v5006_v17, 16 }
  0x66   : > { %6378 = vst [vmem:[#allocation18_spill] sm:$0xff] %v4970_v44  ;;  %v1231_v17 = vrot.slane %v1230_v27, 4  ;;  %v6382_v44 = vrot.slane %v4642_v14, 5 }
  0x67   : > { %v4987_v18 = vsel %vm4637_vm5, %v2298_v56, %v2299_v28  ;;  %v1161_v56 = vshll.u32 %v408_v1, 16  ;;  %v1275_v28 = vshrl.u32 %v4739_v47, 16  ;;  %v1220_v1 = vor.u32 %v1219_v10, %v1216_v38  ;;  %v5055_v47 = vld [vmem:[%s4625_s27 + $0x44] sm:$0x1] }
  0x68   : > { %4121 = vmatmul.mubr.msk.bf16.gmra.mxu0 %vm543_vm4, %v4767_v55  ;;  %6380 = vst [vmem:[#allocation20_spill] sm:$0xff] %v4987_v18  ;;  %v1310_v38 = vshrl.u32 %v4791_v62, 16  ;;  %v1313_v10 = vshll.u32 %v4791_v62, 16  ;;  %v1235_v20 = vrot.slane %v1233_v31, 5  ;;  %v1243_v62 = vrot.slane %v1241_v36, 5 }
  0x69   : > { %4124 = vmatprep.mubr.msk.bf16.mxu0 %vm543_vm4, %v4813_v6  ;;  %v1163_v32 = vrot.slane %v1161_v56, 5  ;;  %v1221_v56 = vrot.slane %v1220_v1, 4  ;;  %v6384_v29 = vmov %v6382_v44  ;;  %v5069_v36 = vrot.slane %v1271_v21, 5 }
  0x6a   : > { %4087 = vmatmul.mubr.msk.bf16.gmra.mxu1 %vm543_vm4, %v4720_v41  ;;  %v1158_v41 = vor.u32 %v1157_v22, %v4965_v0  ;;  %v1209_v22 = vshll.u32 %v4995_v26, 16 }
  0x6b   : > { %4090 = vmatprep.mubr.msk.bf16.mxu1 %vm543_vm4, %v4749_v50  ;;  %v1262_v50 = vshrl.u32 %v4736_v46, 16  ;;  %v1226_v14 = vsel %vm4759_vm8, %v1221_v56, %v5008_v45 }
  0x6c   : > { %v1159_v46 = vrot.slane %v1158_v41, 4  ;;  %v1247_v41 = vshll.u32 %v4715_v40, 16  ;;  %v1211_v30 = vrot.slane %v1209_v22, 5  ;;  %v5050_v40 = vld [vmem:[%s4625_s27 + $0x38] sm:$0x1]  ;;  %v1253_v22 = vrot.slane %v1251_v33, 4 }
  0x6d   : > { %v1264_v1 = vrot.slane %v1262_v50, 4  ;;  %v1277_v33 = vrot.slane %v1275_v28, 4  ;;  %v1337_v28 = vshll.u32 %v4829_v9, 16 }
  0x6e   : > { %v5052_v18 = vrot.slane %v1247_v41, 5  ;;  %v1212_v27 = vsel %vm4759_vm8, %v4989_v5, %v1211_v30  ;;  %v1281_v5 = vshll.u32 %v5055_v47, 16  ;;  %v1295_v41 = vshll.u32 %v4776_v58, 16 }
  0x6f   : > { %v1278_v45 = vor.u32 %v1277_v33, %v5069_v36  ;;  %v1312_v33 = vrot.slane %v1310_v38, 4 }
  0x70   : > { %4125 = vmatmul.mubr.msk.bf16.gmra.mxu0 %vm543_vm4, %v4817_v7 }
  0x71   : > { %4128 = vmatprep.mubr.msk.bf16.mxu0 %vm543_vm4, %v4858_v49  ;;  %v1154_v49 = vsel %vm4759_vm8, %v1149_v60, %v4965_v0  ;;  %v6383_v0 = vrot.slane %v4632_v11, 9  ;;  %v1257_v60 = vshll.u32 %v5050_v40, 16  ;;  %v2362_v11 = vrot.slane %v4905_v12, 5 }
  0x72   : > { %4091 = vmatmul.mubr.msk.bf16.gmra.mxu1 %vm543_vm4, %v4767_v55  ;;  %v1164_v55 = vsel %vm4759_vm8, %v1159_v46, %v1163_v32  ;;  %v2361_v32 = vrot.slane %v6384_v29, 4  ;;  %v1334_v46 = vshrl.u32 %v4829_v9, 16 }
  0x73   : > { %4094 = vmatprep.mubr.msk.bf16.mxu1 %vm543_vm4, %v4813_v6  ;;  %v1267_v6 = vrot.slane %v1265_v52, 5  ;;  %v2360_v31 = vsel %vm4637_vm5, %v6383_v0, %v6382_v44  ;;  %v3646_v50 = vcombine.low %v1154_v49, %v1164_v55  ;;  %v1244_v52 = vor.u32 %v1243_v62, %v1240_v3 }
  0x74   : > { %v1236_v44 = vsel %vm4759_vm8, %v1231_v17, %v1235_v20  ;;  %v1254_v62 = vor.u32 %v1253_v22, %v5052_v18  ;;  %v2363_v3 = vsel %vm4637_vm5, %v2361_v32, %v2362_v11  ;;  %v5089_v17 = vcombine.low %v1202_v23, %v1212_v27  ;;  %v5104_v22 = vld [vmem:[%s4625_s27 + $0x50] sm:$0x1]  ;;  %v5116_v11 = vld [vmem:[%s4625_s27 + $0x5c] sm:$0x1] }
  0x75   : > { %v1268_v12 = vor.u32 %v1267_v6, %v1264_v1  ;;  %v1319_v20 = vshll.u32 %v4794_v63, 16  ;;  %v5096_v30 = vcombine.low %v1226_v14, %v1236_v44  ;;  %v1245_v56 = vrot.slane %v1244_v52, 4  ;;  %v3764_v52 = vld [vmem:[%s6330_s3 + $0xa] sm:$0x3] }
  0x76   : > { %v1259_v21 = vrot.slane %v1257_v60, 5  ;;  %v6386_v49 = vshrl.u32 %v4773_v57, 16  ;;  %v1283_v23 = vrot.slane %v1281_v5, 5  ;;  %v6387_v1 = vshll.u32 %v4773_v57, 16 }
  0x77   : > { %v5108_v0 = vrot.slane %v1295_v41, 5  ;;  %v1255_v32 = vrot.slane %v1254_v62, 4  ;;  %v1269_v27 = vrot.slane %v1268_v12, 4  ;;  %v1279_v60 = vrot.slane %v1278_v45, 4 }
  0x78   : > { %4129 = vmatmul.mubr.msk.bf16.gmra.mxu0 %vm543_vm4, %v3628_v16  ;;  %v5093_v16 = vcombine.low %v2360_v31, %v2363_v3  ;;  %v1288_v55 = vrot.slane %v6386_v49, 4  ;;  %v1291_v6 = vrot.slane %v6387_v1, 5  ;;  %v6388_v31 = vshrl.u32 %v4776_v58, 16 }
  0x79   : > { %4168 = vmatprep.mubr.msk.bf16.mxu0 %vm543_vm4, %v4869_v8  ;;  %v5118_v14 = vrot.slane %v1319_v20, 5  ;;  %v6389_v44 = vshrl.u32 %v4794_v63, 16  ;;  %v1347_v62 = vshrl.u32 %v4832_v15, 16  ;;  %v1250_v38 = vsel %vm4759_vm8, %v1245_v56, %v5052_v18 }
  0x7a   : > { %4095 = vmatmul.mubr.msk.bf16.gmra.mxu1 %vm543_vm4, %v4817_v7  ;;  %6385 = vst [vmem:[#allocation22_spill] sm:$0xff] %v5093_v16  ;;  %v3783_v7 = vld [vmem:[%s6330_s3 + $0x10] sm:$0x3]  ;;  %v1301_v29 = vrot.slane %v6388_v31, 4  ;;  %v1292_v12 = vor.u32 %v1291_v6, %v1288_v55  ;;  %v1305_v45 = vshll.u32 %v5104_v22, 16  ;;  %v5135_v20 = vand.u32 %v3764_v52, %v4610_v4 }
  0x7b   : > { %4134 = vmatprep.mubr.msk.bf16.mxu1 %vm543_vm4, %v3646_v50  ;;  %v1315_v50 = vrot.slane %v1313_v10, 5  ;;  %v1325_v5 = vrot.slane %v6389_v44, 4  ;;  %v5123_v41 = vand.u32 %v3783_v7, %v4610_v4  ;;  %v1343_v10 = vshll.u32 %v4832_v15, 16  ;;  %v5152_v7 = vld [vmem:[%s4625_s27 + $0x68] sm:$0x1] }
  0x7c   : > { %v1302_v3 = vor.u32 %v1301_v29, %v5108_v0  ;;  %v1260_v18 = vsel %vm4759_vm8, %v1255_v32, %v1259_v21  ;;  %v1274_v56 = vsel %vm4759_vm8, %v1269_v27, %v5069_v36  ;;  %v1329_v55 = vshll.u32 %v5116_v11, 16 }
  0x7d   : > { %v1316_v49 = vor.u32 %v1315_v50, %v1312_v33  ;;  %v1284_v4 = vsel %vm4759_vm8, %v1279_v60, %v1283_v23  ;;  %v1336_v1 = vrot.slane %v1334_v46, 4  ;;  %v1339_v6 = vrot.slane %v1337_v28, 5 }
  0x7e   : > { %v1382_v21 = vshrl.u32 %v4669_v24, 16  ;;  %v5159_v36 = vrot.slane %v1343_v10, 5  ;;  %v5161_v31 = vcombine.low %v1250_v38, %v1260_v18  ;;  %v1293_v23 = vrot.slane %v1292_v12, 4 }
  0x7f   : > { %v1303_v29 = vrot.slane %v1302_v3, 4  ;;  %v1307_v32 = vrot.slane %v1305_v45, 5  ;;  %v1385_v46 = vshll.u32 %v4669_v24, 16  ;;  %v5165_v28 = vcombine.low %v1274_v56, %v1284_v4  ;;  %v5194_v4 = vld [vmem:[%s4625_s27 + $0x80] sm:$0x1] }
  0x80   : > { %4169 = vmatmul.mubr.msk.bf16.vlgmr.msra.gmra.mxu0 %vm543_vm4, %v5089_v17  ;;  %v1317_v27 = vrot.slane %v1316_v49, 4  ;;  %v1395_v33 = vshrl.u32 %v4672_v25, 16  ;;  %v1331_v52 = vrot.slane %v1329_v55, 5  ;;  %v1340_v60 = vor.u32 %v1339_v6, %v1336_v1 }
  0x81   : > { %4235 = vmatpush3.bf16.msra.mxu0 %v4879_v19  ;;  %4172 = vmatprep.mubr.msk.bf16.mxu0 %vm543_vm4, %v5096_v30  ;;  %v1326_v19 = vor.u32 %v1325_v5, %v5118_v14  ;;  %v1406_v44 = vshrl.u32 %v4697_v34, 16  ;;  %v1409_v5 = vshll.u32 %v4697_v34, 16  ;;  %v1391_v38 = vshll.u32 %v4672_v25, 16 }
  0x82   : > { %4135 = vmatmul.mubr.msk.bf16.vlgmr.msra.gmra.mxu1 %vm543_vm4, %v4869_v8  ;;  %4302 = vmatprep.subr.bf16.mxu0 %v5123_v41  ;;  %v1349_v8 = vrot.slane %v1347_v62, 4  ;;  %v1419_v24 = vshrl.u32 %v4700_v35, 16  ;;  %v1298_v10 = vsel %vm4759_vm8, %v1293_v23, %v5108_v0  ;;  %v1308_v12 = vsel %vm4759_vm8, %v1303_v29, %v1307_v32 }
  0x83   : > { %4201 = vmatpush3.bf16.msra.mxu1 %v4888_v54  ;;  %4138 = vmatprep.mubr.msk.bf16.mxu1 %vm543_vm4, %v5089_v17  ;;  %v1353_v54 = vshll.u32 %v5152_v7, 16  ;;  %v1327_v50 = vrot.slane %v1326_v19, 4  ;;  %v1322_v25 = vsel %vm4759_vm8, %v1317_v27, %v5118_v14  ;;  %v1384_v3 = vrot.slane %v1382_v21, 4  ;;  %v5203_v21 = vld [vmem:[%s4625_s27 + $0x8c] sm:$0x1] }
  0x84   : > { %4268 = vmatprep.subr.bf16.mxu1 %v5135_v20  ;;  %v1350_v62 = vor.u32 %v1349_v8, %v5159_v36  ;;  %v1415_v45 = vshll.u32 %v4700_v35, 16  ;;  %v1341_v18 = vrot.slane %v1340_v60, 4  ;;  %v1387_v56 = vrot.slane %v1385_v46, 5 }
  0x85   : > { %v1355_v34 = vrot.slane %v1353_v54, 5  ;;  %v1332_v0 = vsel %vm4759_vm8, %v1327_v50, %v1331_v52  ;;  %v1397_v49 = vrot.slane %v1395_v33, 4  ;;  %v5196_v14 = vrot.slane %v1391_v38, 5 }
  0x86   : > { %v1351_v55 = vrot.slane %v1350_v62, 4  ;;  %v1408_v19 = vrot.slane %v1406_v44, 4  ;;  %v1411_v1 = vrot.slane %v1409_v5, 5  ;;  %v5198_v35 = vcombine.low %v1298_v10, %v1308_v12 }
  0x87   : > { %v5200_v6 = vcombine.low %v1322_v25, %v1332_v0  ;;  %v5205_v8 = vrot.slane %v1415_v45, 5  ;;  %v1421_v23 = vrot.slane %v1419_v24, 4  ;;  %v1430_v29 = vshrl.u32 %v4723_v42, 16  ;;  %v5235_v0 = vld [vmem:[%s4625_s27 + $0x98] sm:$0x1] }
  0x88   : > { %4173 = vmatmul.mubr.msk.bf16.gmra.mxu0 %vm543_vm4, %v5161_v31  ;;  %v1433_v32 = vshll.u32 %v4723_v42, 16  ;;  %v1388_v46 = vor.u32 %v1387_v56, %v1384_v3  ;;  %v1401_v27 = vshll.u32 %v5194_v4, 16  ;;  %v1346_v54 = vsel %vm4759_vm8, %v1341_v18, %v5159_v36 }
  0x89   : > { %4176 = vmatprep.mubr.msk.bf16.mxu0 %vm543_vm4, %v5165_v28  ;;  %v1356_v33 = vsel %vm4759_vm8, %v1351_v55, %v1355_v34  ;;  %v1398_v50 = vor.u32 %v1397_v49, %v5196_v14  ;;  %v1412_v52 = vor.u32 %v1411_v1, %v1408_v19  ;;  %v1443_v60 = vshrl.u32 %v4726_v43, 16  ;;  %v5240_v55 = vld [vmem:[%s4625_s27 + $0xa4] sm:$0x1] }
  0x8a   : > { %4139 = vmatmul.mubr.msk.bf16.gmra.mxu1 %vm543_vm4, %v5096_v30  ;;  %v1454_v44 = vshrl.u32 %v4745_v48, 16  ;;  %v1425_v42 = vshll.u32 %v5203_v21, 16  ;;  %v1439_v5 = vshll.u32 %v4726_v43, 16  ;;  %v1457_v36 = vshll.u32 %v4745_v48, 16  ;;  %6390 = vst [vmem:[#allocation23_spill] sm:$0xff] %v5240_v55 }
  0x8b   : > { %4142 = vmatprep.mubr.msk.bf16.mxu1 %vm543_vm4, %v5161_v31  ;;  %v1467_v62 = vshrl.u32 %v4752_v51, 16  ;;  %v1422_v38 = vor.u32 %v1421_v23, %v5205_v8  ;;  %v1463_v24 = vshll.u32 %v4752_v51, 16  ;;  %v5230_v10 = vcombine.low %v1346_v54, %v1356_v33 }
  0x8c   : > { %v1389_v12 = vrot.slane %v1388_v46, 4  ;;  %v1403_v43 = vrot.slane %v1401_v27, 5  ;;  %v1399_v48 = vrot.slane %v1398_v50, 4  ;;  %v1413_v25 = vrot.slane %v1412_v52, 4 }
  0x8d   : > { %v1432_v34 = vrot.slane %v1430_v29, 4  ;;  %v1435_v3 = vrot.slane %v1433_v32, 5  ;;  %v1427_v45 = vrot.slane %v1425_v42, 5  ;;  %v5237_v18 = vrot.slane %v1439_v5, 5 }
  0x8e   : > { %v1445_v51 = vrot.slane %v1443_v60, 4  ;;  %v1456_v56 = vrot.slane %v1454_v44, 4  ;;  %v1423_v49 = vrot.slane %v1422_v38, 4  ;;  %v1459_v19 = vrot.slane %v1457_v36, 5  ;;  %v6391_v36 = vld [vmem:[#allocation14_spill] sm:$0xff] }
  0x8f   : > { %v1465_v1 = vrot.slane %v1463_v24, 5  ;;  %v1469_v23 = vrot.slane %v1467_v62, 4  ;;  %v1478_v46 = vshrl.u32 %v4781_v59, 16  ;;  %v1481_v27 = vshll.u32 %v4781_v59, 16 }
  0x90   : > { %4177 = vmatmul.mubr.msk.bf16.gmra.mxu0 %vm543_vm4, %v5198_v35  ;;  %v1491_v29 = vshrl.u32 %v4788_v61, 16  ;;  %v1394_v32 = vsel %vm4759_vm8, %v1389_v12, %v5196_v14  ;;  %v1436_v54 = vor.u32 %v1435_v3, %v1432_v34  ;;  %v1449_v33 = vshll.u32 %v5235_v0, 16 }
  0x91   : > { %4180 = vmatprep.mubr.msk.bf16.mxu0 %vm543_vm4, %v5200_v6  ;;  %v1404_v50 = vsel %vm4759_vm8, %v1399_v48, %v1403_v43  ;;  %v1418_v52 = vsel %vm4759_vm8, %v1413_v25, %v5205_v8  ;;  %v1446_v59 = vor.u32 %v1445_v51, %v5237_v18  ;;  %v1473_v60 = vshll.u32 %v5240_v55, 16  ;;  %v6392_v8 = vld [vmem:[#allocation15_spill] sm:$0xff] }
  0x92   : > { %4143 = vmatmul.mubr.msk.bf16.gmra.mxu1 %vm543_vm4, %v5165_v28  ;;  %v1428_v14 = vsel %vm4759_vm8, %v1423_v49, %v1427_v45  ;;  %v1460_v44 = vor.u32 %v1459_v19, %v1456_v56  ;;  %v1470_v42 = vor.u32 %v1469_v23, %v1465_v1  ;;  %v1487_v5 = vshll.u32 %v4788_v61, 16  ;;  %v5276_v19 = vld [vmem:[%s4625_s27 + $0xb0] sm:$0x1] }
  0x93   : > { %4146 = vmatprep.mubr.msk.bf16.mxu1 %vm543_vm4, %v5198_v35  ;;  %v1502_v62 = vshrl.u32 %v6391_v36, 16  ;;  %v1505_v38 = vshll.u32 %v6391_v36, 16  ;;  %v1515_v24 = vshrl.u32 %v6392_v8, 16  ;;  %v1511_v12 = vshll.u32 %v6392_v8, 16 }
  0x94   : > { %v5271_v43 = vcombine.low %v1394_v32, %v1404_v50  ;;  %v1437_v48 = vrot.slane %v1436_v54, 4  ;;  %v1451_v25 = vrot.slane %v1449_v33, 5  ;;  %v1480_v61 = vrot.slane %v1478_v46, 4  ;;  %v6393_v50 = vld [vmem:[#allocation16_spill] sm:$0xff]  ;;  %v6394_v33 = vld [vmem:[#allocation17_spill] sm:$0xff] }
  0x95   : > { %v5273_v34 = vcombine.low %v1418_v52, %v1428_v14  ;;  %v1447_v3 = vrot.slane %v1446_v59, 4  ;;  %v1475_v45 = vrot.slane %v1473_v60, 5  ;;  %v1483_v51 = vrot.slane %v1481_v27, 5  ;;  %v5282_v14 = vld [vmem:[%s4625_s27 + $0xbc] sm:$0x1] }
  0x96   : > { %v1461_v56 = vrot.slane %v1460_v44, 4  ;;  %v1471_v49 = vrot.slane %v1470_v42, 4  ;;  %v1489_v23 = vrot.slane %v1487_v5, 5  ;;  %v1493_v36 = vrot.slane %v1491_v29, 4 }
  0x97   : > { %v1504_v8 = vrot.slane %v1502_v62, 4  ;;  %v1507_v55 = vrot.slane %v1505_v38, 5  ;;  %v1513_v16 = vrot.slane %v1511_v12, 5  ;;  %v1517_v32 = vrot.slane %v1515_v24, 4 }
  0x98   : > { %4181 = vmatmul.mubr.msk.bf16.gmra.mxu0 %vm543_vm4, %v5230_v10  ;;  %v1820_v54 = vshrl.u32 %v6393_v50, 16  ;;  %v1823_v46 = vshll.u32 %v6393_v50, 16  ;;  %v1833_v52 = vshrl.u32 %v6394_v33, 16  ;;  %v1442_v27 = vsel %vm4759_vm8, %v1437_v48, %v5237_v18 }
  0x99   : > { %4184 = vmatprep.mubr.msk.bf16.mxu0 %vm543_vm4, %v4919_v39  ;;  %v1452_v29 = vsel %vm4759_vm8, %v1447_v3, %v1451_v25  ;;  %v1484_v59 = vor.u32 %v1483_v51, %v1480_v61  ;;  %v1497_v60 = vshll.u32 %v5276_v19, 16  ;;  %v1466_v44 = vsel %vm4759_vm8, %v1461_v56, %v1465_v1 }
  0x9a   : > { %4147 = vmatmul.mubr.msk.bf16.gmra.mxu1 %vm543_vm4, %v5200_v6  ;;  %v1476_v42 = vsel %vm4759_vm8, %v1471_v49, %v1475_v45  ;;  %v1494_v5 = vor.u32 %v1493_v36, %v1489_v23  ;;  %v1829_v62 = vshll.u32 %v6394_v33, 16  ;;  %v1508_v18 = vor.u32 %v1507_v55, %v1504_v8  ;;  %v5309_v8 = vld [vmem:[%s4824_s15 + $0x8] sm:$0x1] }
  0x9b   : > { %4150 = vmatprep.mubr.msk.bf16.mxu1 %vm543_vm4, %v5230_v10  ;;  %v1518_v38 = vor.u32 %v1517_v32, %v1513_v16  ;;  %v1521_v24 = vshll.u32 %v5282_v14, 16  ;;  %v5304_v12 = vcombine.low %v1442_v27, %v1452_v29  ;;  %v5306_v1 = vcombine.low %v1466_v44, %v1476_v42 }
  0x9c   : > { %v1485_v48 = vrot.slane %v1484_v59, 4  ;;  %v1499_v25 = vrot.slane %v1497_v60, 5  ;;  %v1822_v61 = vrot.slane %v1820_v54, 4  ;;  %v1495_v3 = vrot.slane %v1494_v5, 4 }
  0x9d   : > { %v1825_v45 = vrot.slane %v1823_v46, 5  ;;  %v1831_v51 = vrot.slane %v1829_v62, 5  ;;  %v1835_v56 = vrot.slane %v1833_v52, 4  ;;  %v1509_v49 = vrot.slane %v1508_v18, 4  ;;  %v6395_v62 = vld [vmem:[#allocation6_spill] sm:$0xff] }
  0x9e   : > { %v1519_v55 = vrot.slane %v1518_v38, 4  ;;  %v1523_v36 = vrot.slane %v1521_v24, 5  ;;  %v1490_v32 = vsel %vm4759_vm8, %v1485_v48, %v1489_v23  ;;  %v1500_v50 = vsel %vm4759_vm8, %v1495_v3, %v1499_v25  ;;  %v5345_v38 = vld [vmem:[%s5002_s8 + $0x8] sm:$0x1]  ;;  %v6396_v3 = vld [vmem:[#allocation5_spill] sm:$0xff] }
  0x9f   : > { %v1826_v54 = vor.u32 %v1825_v45, %v1822_v61  ;;  %v1836_v46 = vor.u32 %v1835_v56, %v1831_v51  ;;  %v1839_v33 = vshll.u32 %v5309_v8, 16  ;;  %v1514_v52 = vsel %vm4759_vm8, %v1509_v49, %v1513_v16 }
  0xa0   : > { %4185 = vmatmul.mubr.msk.bf16.gmra.mxu0 %vm543_vm4, %v5271_v43  ;;  %v1524_v23 = vsel %vm4759_vm8, %v1519_v55, %v1523_v36  ;;  %v5328_v27 = vcombine.low %v1490_v32, %v1500_v50  ;;  %v2915_v42 = vrot.slane %v5021_v2, 5  ;;  %v2310_v18 = vrot.slane %v6395_v62, 5  ;;  %v6397_v32 = vld [vmem:[#allocation18_spill] sm:$0xff]  ;;  %v6398_v50 = vld [vmem:[#allocation20_spill] sm:$0xff] }
  0xa1   : > { %4188 = vmatprep.mubr.msk.bf16.mxu0 %vm543_vm4, %v5273_v34  ;;  %v5330_v29 = vcombine.low %v1514_v52, %v1524_v23  ;;  %v1827_v59 = vrot.slane %v1826_v54, 4  ;;  %v1837_v60 = vrot.slane %v1836_v46, 4  ;;  %v1841_v44 = vrot.slane %v1839_v33, 5  ;;  %v6401_v23 = vld [vmem:[#allocation10_spill] sm:$0xff] }
  0xa2   : > { %4151 = vmatmul.mubr.msk.bf16.gmra.mxu1 %vm543_vm4, %v4919_v39  ;;  %v3782_v24 = vrot.slane %v5018_v37, 9  ;;  %v2918_v48 = vrot.slane %v5345_v38, 5  ;;  %v2917_v61 = vrot.slane %v2915_v42, 4  ;;  %v3716_v45 = vrot.slane %v6396_v3, 9  ;;  %v6405_v3 = vld [vmem:[#allocation19_spill] sm:$0xff] }
  0xa3   : > { %4154 = vmatprep.mubr.msk.bf16.mxu1 %vm543_vm4, %v5271_v43  ;;  %v1832_v16 = vsel %vm4759_vm8, %v1827_v59, %v1831_v51  ;;  %v1842_v5 = vsel %vm4759_vm8, %v1837_v60, %v1841_v44  ;;  %v2312_v51 = vrot.slane %v2310_v18, 4  ;;  %v2313_v56 = vrot.slane %v4995_v26, 5  ;;  %v6400_v26 = vld [vmem:[#allocation8_spill] sm:$0xff]  ;;  %v6402_v44 = vld [vmem:[#allocation7_spill] sm:$0xff] }
  0xa4   : > { %v5351_v25 = vcombine.low %v1832_v16, %v1842_v5  ;;  %v5357_v49 = vsel %vm4637_vm5, %v3782_v24, %v2915_v42  ;;  %v5361_v55 = vsel %vm4637_vm5, %v2917_v61, %v2918_v48  ;;  %v6399_v54 = vcombine.low %v6397_v32, %v6398_v50  ;;  %v6403_v5 = vld [vmem:[#allocation21_spill] sm:$0xff] }
  0xa5   : > { %v3784_v36 = vcombine.low %v5357_v49, %v5361_v55  ;;  %v2317_v46 = vrot.slane %v6400_v26, 5  ;;  %v2311_v33 = vsel %vm4637_vm5, %v3716_v45, %v2310_v18  ;;  %v2314_v52 = vsel %vm4637_vm5, %v2312_v51, %v2313_v56  ;;  %v6404_v24 = vld [vmem:[#allocation9_spill] sm:$0xff]  ;;  %v6406_v51 = vld [vmem:[#allocation12_spill] sm:$0xff]  ;;  %v6407_v26 = vld [vmem:[#allocation11_spill] sm:$0xff] }
  0xa6   : > { %v2324_v59 = vrot.slane %v6401_v23, 5  ;;  %v5381_v60 = vcombine.low %v2311_v33, %v2314_v52  ;;  %v3717_v42 = vrot.slane %v6402_v44, 9  ;;  %v2320_v62 = vrot.slane %v6403_v5, 5 }
  0xa7   : > { %v2319_v16 = vrot.slane %v2317_v46, 4  ;;  %v3718_v48 = vrot.slane %v6404_v24, 9  ;;  %v2327_v18 = vrot.slane %v5050_v40, 5  ;;  %v2331_v56 = vrot.slane %v6406_v51, 5 }
  0xa8   : > { %4189 = vmatmul.mubr.msk.bf16.gmra.mxu0 %vm543_vm4, %v5304_v12  ;;  %v2326_v61 = vrot.slane %v2324_v59, 4  ;;  %v2338_v32 = vrot.slane %v4776_v58, 5  ;;  %v2334_v33 = vrot.slane %v5055_v47, 5  ;;  %v3720_v52 = vrot.slane %v4773_v57, 9 }
  0xa9   : > { %4192 = vmatprep.mubr.msk.bf16.mxu0 %vm543_vm4, %v5306_v1  ;;  %v2321_v45 = vsel %vm4637_vm5, %v2319_v16, %v2320_v62  ;;  %v2325_v40 = vsel %vm4637_vm5, %v3718_v48, %v2324_v59  ;;  %v2341_v59 = vrot.slane %v5104_v22, 5  ;;  %v2352_v22 = vrot.slane %v4832_v15, 5 }
  0xaa   : > { %4155 = vmatmul.mubr.msk.bf16.gmra.mxu1 %vm543_vm4, %v5273_v34  ;;  %v2340_v23 = vrot.slane %v2338_v32, 4  ;;  %v2339_v47 = vsel %vm4637_vm5, %v3720_v52, %v2338_v32  ;;  %v3722_v62 = vrot.slane %v4829_v9, 9  ;;  %v2355_v48 = vrot.slane %v5152_v7, 5  ;;  %v4417_v7 = vld [vmem:[%s4625_s27 + $0x7c] sm:$0xf] }
  0xab   : > { %4158 = vmatprep.mubr.msk.bf16.mxu1 %vm543_vm4, %v5304_v12  ;;  %v2354_v24 = vrot.slane %v2352_v22, 4 }
  0xac   : > { %v2342_v57 = vsel %vm4637_vm5, %v2340_v23, %v2341_v59  ;;  %v2353_v9 = vsel %vm4637_vm5, %v3722_v62, %v2352_v22  ;;  %v2376_v23 = vrot.slane %v5203_v21, 5 }
  0xb0   : > { %4193 = vmatmul.mubr.msk.bf16.gmra.mxu0 %vm543_vm4, %v5328_v27 }
  0xb1   : > { %4196 = vmatprep.mubr.msk.bf16.mxu0 %vm543_vm4, %v5330_v29 }
  0xb2   : > { %4159 = vmatmul.mubr.msk.bf16.gmra.mxu1 %vm543_vm4, %v5306_v1 }
  0xb3   : > { %4162 = vmatprep.mubr.msk.bf16.mxu1 %vm543_vm4, %v5328_v27 }
  0xb8   : > { %4197 = vmatmul.mubr.msk.bf16.gmra.mxu0 %vm543_vm4, %v5351_v25 }
  0xb9   : > { %4236 = vmatprep.mubr.msk.bf16.mxu0 %vm543_vm4, %v6399_v54 }
  0xba   : > { %4163 = vmatmul.mubr.msk.bf16.gmra.mxu1 %vm543_vm4, %v5330_v29 }
  0xbb   : > { %4202 = vmatprep.mubr.msk.bf16.mxu1 %vm543_vm4, %v5089_v17  ;;  %v2318_v17 = vsel %vm4637_vm5, %v3717_v42, %v2317_v46  ;;  %v3719_v46 = vrot.slane %v6407_v26, 9  ;;  %v5435_v42 = vcombine.low %v2339_v47, %v2342_v57  ;;  %v4420_v26 = vld [vmem:[%s4625_s27 + $0x94] sm:$0xf]  ;;  %v6409_v47 = vld [vmem:[#allocation22_spill] sm:$0xff]  ;;  %v4423_v57 = vld [vmem:[%s4625_s27 + $0xa0] sm:$0xf] }
  0xbc   : > { %v5407_v50 = vcombine.low %v2318_v17, %v2321_v45  ;;  %v4418_v45 = vld [vmem:[%s4625_s27 + $0x78] sm:$0xf]  ;;  %v2387_v22 = vrot.slane %v4423_v57, 5 }
  0xbd   : > { %v2332_v58 = vsel %vm4637_vm5, %v3719_v46, %v2331_v56  ;;  %v3724_v51 = vrot.slane %v4418_v45, 9 }
  0xc0   : > { %4237 = vmatmul.mubr.msk.bf16.vlgmr.msra.gmra.mxu0 %vm543_vm4, %v6405_v3 }
  0xc1   : > { %4303 = vmatpush3.bf16.msra.mxu0 %v5123_v41  ;;  %4240 = vmatprep.mubr.msk.bf16.mxu0 %vm543_vm4, %v5381_v60  ;;  %v2328_v41 = vsel %vm4637_vm5, %v2326_v61, %v2327_v18  ;;  %v2366_v61 = vrot.slane %v4417_v7, 5 }
  0xc2   : > { %4203 = vmatmul.mubr.msk.bf16.vlgmr.msra.gmra.mxu1 %vm543_vm4, %v5096_v30  ;;  %v5409_v54 = vcombine.low %v2325_v40, %v2328_v41  ;;  %v2333_v30 = vrot.slane %v2331_v56, 4  ;;  %v2369_v56 = vrot.slane %v5194_v4, 5  ;;  %v4419_v40 = vld [vmem:[%s4625_s27 + $0x88] sm:$0xf]  ;;  %v2380_v4 = vrot.slane %v4420_v26, 5 }
  0xc3   : > { %4269 = vmatpush3.bf16.msra.mxu1 %v5135_v20  ;;  %4206 = vmatprep.mubr.msk.bf16.mxu1 %vm543_vm4, %v5161_v31  ;;  %v2345_v31 = vrot.slane %v4794_v63, 5  ;;  %v6408_v63 = vld [vmem:[#allocation13_spill] sm:$0xff]  ;;  %v2373_v41 = vrot.slane %v4419_v40, 5 }
  0xc4   : > { %v2335_v20 = vsel %vm4637_vm5, %v2333_v30, %v2334_v33  ;;  %v3721_v16 = vrot.slane %v6408_v63, 9  ;;  %v4421_v30 = vld [vmem:[%s4625_s27 + $0x84] sm:$0xf] }
  0xc5   : > { %v5433_v44 = vcombine.low %v2332_v58, %v2335_v20  ;;  %v2347_v5 = vrot.slane %v2345_v31, 4  ;;  %v3725_v33 = vrot.slane %v4421_v30, 9  ;;  %v2375_v52 = vrot.slane %v2373_v41, 4 }
  0xc6   : > { %v2346_v15 = vsel %vm4637_vm5, %v3721_v16, %v2345_v31  ;;  %v2382_v58 = vrot.slane %v2380_v4, 4  ;;  %v2383_v20 = vrot.slane %v5235_v0, 5 }
  0xc7   : > { %v2377_v21 = vsel %vm4637_vm5, %v2375_v52, %v2376_v23 }
  0xc8   : > { %4241 = vmatmul.mubr.msk.bf16.gmra.mxu0 %vm543_vm4, %v5407_v50 }
  0xc9   : > { %4244 = vmatprep.mubr.msk.bf16.mxu0 %vm543_vm4, %v5409_v54 }
  0xca   : > { %4207 = vmatmul.mubr.msk.bf16.gmra.mxu1 %vm543_vm4, %v5165_v28  ;;  %v2348_v28 = vrot.slane %v5116_v11, 5  ;;  %v2356_v11 = vsel %vm4637_vm5, %v2354_v24, %v2355_v48  ;;  %v2048_v24 = vshrl.u32 %v5018_v37, 16  ;;  %v2051_v48 = vshll.u32 %v5018_v37, 16 }
  0xcb   : > { %4210 = vmatprep.mubr.msk.bf16.mxu1 %vm543_vm4, %v5198_v35  ;;  %v5460_v17 = vcombine.low %v2353_v9, %v2356_v11 }
  0xcc   : > { %v2349_v35 = vsel %vm4637_vm5, %v2347_v5, %v2348_v28  ;;  %v2384_v5 = vsel %vm4637_vm5, %v2382_v58, %v2383_v20  ;;  %v4424_v28 = vld [vmem:[%s4625_s27 + $0xac] sm:$0xf]  ;;  %v2053_v26 = vrot.slane %v2051_v48, 5  ;;  %v4428_v48 = vld [vmem:[%s4625_s27 + $0xb4] sm:$0xf] }
  0xcd   : > { %v5458_v18 = vcombine.low %v2346_v15, %v2349_v35  ;;  %v2394_v62 = vrot.slane %v4424_v28, 5  ;;  %v2061_v15 = vshrl.u32 %v5021_v2, 16 }
  0xcf   : > { %v2063_v30 = vrot.slane %v2061_v15, 4 }
  0xd0   : > { %4245 = vmatmul.mubr.msk.bf16.gmra.mxu0 %vm543_vm4, %v5433_v44 }
  0xd1   : > { %4248 = vmatprep.mubr.msk.bf16.mxu0 %vm543_vm4, %v5435_v42 }
  0xd2   : > { %4211 = vmatmul.mubr.msk.bf16.gmra.mxu1 %vm543_vm4, %v5200_v6  ;;  %v2368_v6 = vrot.slane %v2366_v61, 4 }
  0xd3   : > { %4214 = vmatprep.mubr.msk.bf16.mxu1 %vm543_vm4, %v5230_v10  ;;  %v2367_v10 = vsel %vm4637_vm5, %v3724_v51, %v2366_v61  ;;  %v4425_v61 = vld [vmem:[%s4625_s27 + $0x9c] sm:$0xf]  ;;  %v2389_v51 = vrot.slane %v2387_v22, 4 }
  0xd4   : > { %v2370_v32 = vsel %vm4637_vm5, %v2368_v6, %v2369_v56  ;;  %v3727_v45 = vrot.slane %v4425_v61, 9  ;;  %v6410_v6 = vld [vmem:[#allocation23_spill] sm:$0xff] }
  0xd5   : > { %v5478_v46 = vcombine.low %v2367_v10, %v2370_v32  ;;  %v2390_v37 = vrot.slane %v6410_v6, 5  ;;  %v2397_v10 = vrot.slane %v5276_v19, 5  ;;  %v2050_v32 = vrot.slane %v2048_v24, 4 }
  0xd6   : > { %v2388_v23 = vsel %vm4637_vm5, %v3727_v45, %v2387_v22 }
  0xd7   : > { %v2391_v19 = vsel %vm4637_vm5, %v2389_v51, %v2390_v37  ;;  %v2054_v57 = vor.u32 %v2053_v26, %v2050_v32 }
  0xd8   : > { %4249 = vmatmul.mubr.msk.bf16.gmra.mxu0 %vm543_vm4, %v5458_v18 }
  0xd9   : > { %4252 = vmatprep.mubr.msk.bf16.mxu0 %vm543_vm4, %v5460_v17  ;;  %v2055_v45 = vrot.slane %v2054_v57, 4 }
  0xda   : > { %4215 = vmatmul.mubr.msk.bf16.gmra.mxu1 %vm543_vm4, %v4919_v39  ;;  %v4422_v39 = vld [vmem:[%s4625_s27 + $0x90] sm:$0xf] }
  0xdb   : > { %4218 = vmatprep.mubr.msk.bf16.mxu1 %vm543_vm4, %v5271_v43  ;;  %v3726_v59 = vrot.slane %v4422_v39, 9  ;;  %v2374_v43 = vsel %vm4637_vm5, %v3725_v33, %v2373_v41  ;;  %v2396_v41 = vrot.slane %v2394_v62, 4  ;;  %v4427_v39 = vld [vmem:[%s4625_s27 + $0xb8] sm:$0xf] }
  0xdc   : > { %v5516_v11 = vcombine.low %v2374_v43, %v2377_v21 }
  0xdd   : > { %v2381_v16 = vsel %vm4637_vm5, %v3726_v59, %v2380_v4  ;;  %v2401_v59 = vrot.slane %v4427_v39, 5  ;;  %v2398_v21 = vsel %vm4637_vm5, %v2396_v41, %v2397_v10 }
  0xde   : > { %v5518_v7 = vcombine.low %v2381_v16, %v2384_v5  ;;  %v2067_v16 = vshll.u32 %v5345_v38, 16 }
  0xdf   : > { %v2403_v15 = vrot.slane %v2401_v59, 4 }
  0xe0   : > { %v5484_v31 = vpop.f32.mrf.mxu0  ;;  %4253 = vmatmul.mubr.msk.bf16.gmra.mxu0 %vm543_vm4, %v6409_v47  ;;  %v2069_v38 = vrot.slane %v2067_v16, 5 }
  0xe1   : > { %4256 = vmatprep.mubr.msk.bf16.mxu0 %vm543_vm4, %v5478_v46  ;;  %v5495_v63 = vpop.f32.mrf.mxu1 }
  0xe2   : > { %4219 = vmatmul.mubr.msk.bf16.gmra.mxu1 %vm543_vm4, %v5273_v34  ;;  %v5499_v0 = vpop.f32.mrf.mxu0  ;;  %v2057_v34 = vshll.u32 %v5021_v2, 16 }
  0xe3   : > { %4222 = vmatprep.mubr.msk.bf16.mxu1 %vm543_vm4, %v5304_v12  ;;  %v5512_v35 = vpop.f32.mrf.mxu1  ;;  %v4426_v12 = vld [vmem:[%s4625_s27 + $0xa8] sm:$0xf]  ;;  %s4435_s27 = sshll.u32 %s4510_s14, 4  ;;  %s4436_s27 = int_to_ptr.vmem [resolvable:$false] %s4435_s27 }
  0xe4   : > { %v5514_v9 = vpop.f32.mrf.mxu0  ;;  %v3728_v2 = vrot.slane %v4426_v12, 9  ;;  %v2059_v4 = vrot.slane %v2057_v34, 5  ;;  %v2404_v34 = vrot.slane %v5282_v14, 5  ;;  %p4438_p1 = scmp.lt.s32.totalorder %s6274_s30, %s4436_s27 }
  0xe5   : > { %v5522_v56 = vpop.f32.mrf.mxu1 }
  0xe6   : > { %v5524_v40 = vpop.f32.mrf.mxu0  ;;  %v2395_v43 = vsel %vm4637_vm5, %v3728_v2, %v2394_v62  ;;  %v2064_v22 = vor.u32 %v2063_v30, %v2059_v4  ;;  %v3729_v62 = vrot.slane %v4428_v48, 9  ;;  %v2405_v12 = vsel %vm4637_vm5, %v2403_v15, %v2404_v34 }
  0xe7   : > { %v5528_v33 = vpop.f32.mrf.mxu1  ;;  %v5560_v24 = vcombine.low %v2395_v43, %v2398_v21  ;;  %v2060_v10 = vsel %vm4759_vm8, %v2055_v45, %v2059_v4 }
  0xe8   : > { %v5530_v52 = vpop.f32.mrf.mxu0  ;;  %4257 = vmatmul.mubr.msk.bf16.gmra.mxu0 %vm543_vm4, %v5516_v11  ;;  %v2065_v51 = vrot.slane %v2064_v22, 4  ;;  %v2402_v14 = vsel %vm4637_vm5, %v3729_v62, %v2401_v59 }
  0xe9   : > { %4260 = vmatprep.mubr.msk.bf16.mxu0 %vm543_vm4, %v5518_v7  ;;  %v5541_v58 = vpop.f32.mrf.mxu1 }
  0xea   : > { %4223 = vmatmul.mubr.msk.bf16.gmra.mxu1 %vm543_vm4, %v5306_v1  ;;  %v5545_v20 = vpop.f32.mrf.mxu0  ;;  %v5558_v1 = vcombine.low %v2388_v23, %v2391_v19  ;;  %v2070_v32 = vsel %vm4759_vm8, %v2065_v51, %v2069_v38  ;;  %v5596_v23 = vcombine.low %v2402_v14, %v2405_v12 }
  0xeb   : > { %4226 = vmatprep.mubr.msk.bf16.mxu1 %vm543_vm4, %v5328_v27  ;;  %v5554_v5 = vpop.f32.mrf.mxu1  ;;  %v3697_v39 = vcombine.low %v2060_v10, %v2070_v32 }
  0xec   : > { %v5556_v28 = vpop.f32.mrf.mxu0 }
  0xed   : > { %v5564_v61 = vpop.f32.mrf.mxu1 }
  0xee   : > { %v5566_v27 = vpop.f32.mrf.mxu0 }
  0xef   : > { %v5568_v6 = vpop.f32.mrf.mxu1 }
  0xf0   : > { %v5570_v37 = vpop.f32.mrf.mxu0  ;;  %4261 = vmatmul.mubr.msk.bf16.gmra.mxu0 %vm543_vm4, %v5558_v1 }
  0xf1   : > { %4264 = vmatprep.mubr.msk.bf16.mxu0 %vm543_vm4, %v5560_v24  ;;  %v5580_v2 = vpop.f32.mrf.mxu1 }
  0xf2   : > { %4227 = vmatmul.mubr.msk.bf16.gmra.mxu1 %vm543_vm4, %v5330_v29  ;;  %v5584_v41 = vpop.f32.mrf.mxu0 }
  0xf3   : > { %4230 = vmatprep.mubr.msk.bf16.mxu1 %vm543_vm4, %v5351_v25  ;;  %v5592_v26 = vpop.f32.mrf.mxu1 }
  0xf4   : > { %v5594_v30 = vpop.f32.mrf.mxu0 }
  0xf5   : > { %v5598_v19 = vpop.f32.mrf.mxu1 }
  0xf6   : > { %v5600_v29 = vpop.f32.mrf.mxu0 }
  0xf7   : > { %v5602_v59 = vpop.f32.mrf.mxu1 }
  0xf8   : > { %v5604_v25 = vpop.f32.mrf.mxu0  ;;  %4265 = vmatmul.mubr.msk.bf16.gmra.mxu0 %vm543_vm4, %v5596_v23 }
  0xf9   : > { %4304 = vmatprep.mubr.msk.bf16.mxu0 %vm543_vm4, %v5381_v60  ;;  %v5610_v53 = vpop.f32.mrf.mxu1 }
  0xfa   : > { %4231 = vmatmul.mubr.msk.bf16.gmra.mxu1 %vm543_vm4, %v3697_v39  ;;  %v5613_v4 = vpop.f32.mrf.mxu0 }
  0xfb   : > { %4270 = vmatprep.mubr.msk.bf16.mxu1 %vm543_vm4, %v6405_v3  ;;  %v5617_v43 = vpop.f32.mrf.mxu1 }
  0xfc   : > { %v5619_v21 = vpop.f32.mrf.mxu0 }
  0xfd   : > { %v5621_v57 = vpop.f32.mrf.mxu1 }
  0xfe   : > { %v5623_v22 = vpop.f32.mrf.mxu0 }
  0xff   : > { %v5625_v16 = vpop.f32.mrf.mxu1 }
 0x100   : > { %v4102_v48 = vpop.f32.mrf.mxu0  ;;  %4305 = vmatmul.mubr.msk.bf16.vlgmr.msra.gmra.mxu0 %vm543_vm4, %v5407_v50 }
 0x101   : > { %4308 = vmatprep.mubr.msk.bf16.mxu0 %vm543_vm4, %v5409_v54 }
 0x102   : > { %v4068_v62 = vpop.f32.mrf.mxu1  ;;  %4271 = vmatmul.mubr.msk.bf16.vlgmr.msra.gmra.mxu1 %vm543_vm4, %v5381_v60  ;;  %v979_v3 = vpop.f32.mrf.mxu0 }
 0x103   : > { %v814_v15 = vadd.f32 %v4068_v62, %v5484_v31  ;;  %4274 = vmatprep.mubr.msk.bf16.mxu1 %vm543_vm4, %v5407_v50 }
 0x104   : > { %v805_v34 = vpop.f32.mrf.mxu1  ;;  %v4103_v45 = vpop.f32.mrf.mxu0 }
 0x105   : > { %v5636_v51 = vadd.f32 %v4102_v48, %v814_v15  ;;  %v806_v38 = vadd.f32 %v805_v34, %v5499_v0 }
 0x106   : > { %v4069_v14 = vpop.f32.mrf.mxu1  ;;  %v982_v12 = vpop.f32.mrf.mxu0 }
 0x107   : > { %v5639_v10 = vadd.f32 %v979_v3, %v806_v38  ;;  %v817_v32 = vadd.f32 %v4069_v14, %v5514_v9 }
 0x108   : > { %v808_v39 = vpop.f32.mrf.mxu1  ;;  %v4106_v60 = vpop.f32.mrf.mxu0  ;;  %4309 = vmatmul.mubr.msk.bf16.gmra.mxu0 %vm543_vm4, %v5433_v44 }
 0x109   : > { %v5644_v31 = vadd.f32 %v4103_v45, %v817_v32  ;;  %v809_v50 = vadd.f32 %v808_v39, %v5524_v40  ;;  %4312 = vmatprep.mubr.msk.bf16.mxu0 %vm543_vm4, %v5435_v42 }
 0x10a   : > { %v4072_v48 = vpop.f32.mrf.mxu1  ;;  %4275 = vmatmul.mubr.msk.bf16.gmra.mxu1 %vm543_vm4, %v5409_v54  ;;  %v995_v0 = vpop.f32.mrf.mxu0 }
 0x10b   : > { %v5651_v62 = vadd.f32 %v982_v12, %v809_v50  ;;  %v830_v9 = vadd.f32 %v4072_v48, %v5530_v52  ;;  %4278 = vmatprep.mubr.msk.bf16.mxu1 %vm543_vm4, %v5433_v44 }
 0x10c   : > { %v821_v3 = vpop.f32.mrf.mxu1  ;;  %v4107_v15 = vpop.f32.mrf.mxu0 }
 0x10d   : > { %v5656_v34 = vadd.f32 %v4106_v60, %v830_v9  ;;  %v822_v40 = vadd.f32 %v821_v3, %v5545_v20 }
 0x10e   : > { %v4073_v45 = vpop.f32.mrf.mxu1  ;;  %v998_v38 = vpop.f32.mrf.mxu0 }
 0x10f   : > { %v5659_v14 = vadd.f32 %v995_v0, %v822_v40  ;;  %v833_v54 = vadd.f32 %v4073_v45, %v5556_v28 }
 0x110   : > { %v824_v32 = vpop.f32.mrf.mxu1  ;;  %v4110_v12 = vpop.f32.mrf.mxu0  ;;  %4313 = vmatmul.mubr.msk.bf16.gmra.mxu0 %vm543_vm4, %v5458_v18 }
 0x111   : > { %v5664_v52 = vadd.f32 %v4107_v15, %v833_v54  ;;  %v825_v44 = vadd.f32 %v824_v32, %v5566_v27  ;;  %4316 = vmatprep.mubr.msk.bf16.mxu0 %vm543_vm4, %v5460_v17 }
 0x112   : > { %v4076_v39 = vpop.f32.mrf.mxu1  ;;  %4279 = vmatmul.mubr.msk.bf16.gmra.mxu1 %vm543_vm4, %v5435_v42  ;;  %v1011_v20 = vpop.f32.mrf.mxu0 }
 0x113   : > { %v5671_v60 = vadd.f32 %v998_v38, %v825_v44  ;;  %v846_v28 = vadd.f32 %v4076_v39, %v5570_v37  ;;  %4282 = vmatprep.mubr.msk.bf16.mxu1 %vm543_vm4, %v5458_v18 }
 0x114   : > { %v837_v50 = vpop.f32.mrf.mxu1  ;;  %v4111_v48 = vpop.f32.mrf.mxu0 }
 0x115   : > { %v5676_v0 = vadd.f32 %v4110_v12, %v846_v28  ;;  %v838_v27 = vadd.f32 %v837_v50, %v5584_v41 }
 0x116   : > { %v4077_v9 = vpop.f32.mrf.mxu1  ;;  %v1014_v3 = vpop.f32.mrf.mxu0 }
 0x117   : > { %v5679_v15 = vadd.f32 %v1011_v20, %v838_v27  ;;  %v849_v42 = vadd.f32 %v4077_v9, %v5594_v30  ;;  %v4429_v9 = vld [vmem:[%s4824_s15 + $0x4] sm:$0xf] }
 0x118   : > { %v840_v40 = vpop.f32.mrf.mxu1  ;;  %v4114_v45 = vpop.f32.mrf.mxu0  ;;  %4317 = vmatmul.mubr.msk.bf16.gmra.mxu0 %vm543_vm4, %v6409_v47 }
 0x119   : > { %v5684_v37 = vadd.f32 %v4111_v48, %v849_v42  ;;  %v841_v18 = vadd.f32 %v840_v40, %v5600_v29  ;;  %4320 = vmatprep.mubr.msk.bf16.mxu0 %vm543_vm4, %v5478_v46 }
 0x11a   : > { %v4080_v38 = vpop.f32.mrf.mxu1  ;;  %4283 = vmatmul.mubr.msk.bf16.gmra.mxu1 %vm543_vm4, %v5460_v17  ;;  %v1027_v41 = vpop.f32.mrf.mxu0 }
 0x11b   : > { %v5691_v54 = vadd.f32 %v1014_v3, %v841_v18  ;;  %v862_v30 = vadd.f32 %v4080_v38, %v5604_v25  ;;  %4286 = vmatprep.mubr.msk.bf16.mxu1 %vm543_vm4, %v6409_v47 }
 0x11c   : > { %v853_v32 = vpop.f32.mrf.mxu1  ;;  %v4115_v12 = vpop.f32.mrf.mxu0 }
 0x11d   : > { %v5696_v44 = vadd.f32 %v4114_v45, %v862_v30  ;;  %v854_v29 = vadd.f32 %v853_v32, %v5613_v4  ;;  %v4430_v30 = vld [vmem:[%s4824_s15] sm:$0xf]  ;;  %s4437_s15 = scalar_lea.vmem %s4436_s27, 4096 }
 0x11e   : > { %v4081_v39 = vpop.f32.mrf.mxu1  ;;  %v1030_v20 = vpop.f32.mrf.mxu0  ;;  %p4439_p2 = scmp.lt.s32.totalorder %s4437_s15, %s4431_s13 }
 0x11f   : > { %v5699_v28 = vadd.f32 %v1027_v41, %v854_v29  ;;  %v865_v17 = vadd.f32 %v4081_v39, %v5619_v21  ;;  %v2703_v21 = vrot.slane %v4429_v9, 5 }
 0x120   : > { %v856_v50 = vpop.f32.mrf.mxu1  ;;  %v4118_v48 = vpop.f32.mrf.mxu0  ;;  %4321 = vmatmul.mubr.msk.bf16.gmra.mxu0 %vm543_vm4, %v5516_v11  ;;  %p4440_p3 = por %p4439_p2, %p4438_p1 }
 0x121   : > { %v5704_v25 = vadd.f32 %v4115_v12, %v865_v17  ;;  %v857_v47 = vadd.f32 %v856_v50, %v5623_v22  ;;  %4324 = vmatprep.mubr.msk.bf16.mxu0 %vm543_vm4, %v5518_v7  ;;  %v2705_v32 = vrot.slane %v2703_v21, 4  ;;  %v2706_v12 = vrot.slane %v5309_v8, 5 }
 0x122   : > { %v4084_v4 = vpop.f32.mrf.mxu1  ;;  %4287 = vmatmul.mubr.msk.bf16.gmra.mxu1 %vm543_vm4, %v5478_v46  ;;  %v1043_v27 = vpop.f32.mrf.mxu0  ;;  %v3763_v46 = vrot.slane %v4430_v30, 9  ;;  %p4441_p5 = pnand %p4440_p3, %p4434_p0 }
 0x123   : > { %v5712_v3 = vadd.f32 %v1030_v20, %v857_v47  ;;  %v878_v42 = vadd.f32 %v4084_v4, %v5495_v63  ;;  %4290 = vmatprep.mubr.msk.bf16.mxu1 %vm543_vm4, %v5516_v11  ;;  %v2707_v50 = vsel %vm4637_vm5, %v2705_v32, %v2706_v12 }
 0x124   : > { %v869_v40 = vpop.f32.mrf.mxu1  ;;  %v4119_v22 = vpop.f32.mrf.mxu0 }
 0x125   : > { %v5717_v45 = vadd.f32 %v4118_v48, %v878_v42  ;;  %v870_v18 = vadd.f32 %v869_v40, %v5512_v35 }
 0x126   : > { %v4085_v38 = vpop.f32.mrf.mxu1  ;;  %v1046_v41 = vpop.f32.mrf.mxu0 }
 0x127   : > { %v5722_v29 = vadd.f32 %v1043_v27, %v870_v18  ;;  %v881_v63 = vadd.f32 %v4085_v38, %v5522_v56  ;;  %v2704_v56 = vsel %vm4637_vm5, %v3763_v46, %v2703_v21 }
 0x128   : > { %v872_v39 = vpop.f32.mrf.mxu1  ;;  %v4122_v20 = vpop.f32.mrf.mxu0  ;;  %4325 = vmatmul.mubr.msk.bf16.gmra.mxu0 %vm543_vm4, %v5558_v1  ;;  %v3765_v9 = vcombine.low %v2704_v56, %v2707_v50 }
 0x129   : > { %v5727_v11 = vadd.f32 %v4119_v22, %v881_v63  ;;  %v873_v35 = vadd.f32 %v872_v39, %v5528_v33  ;;  %4328 = vmatprep.mubr.msk.bf16.mxu0 %vm543_vm4, %v5560_v24 }
 0x12a   : > { %v4088_v17 = vpop.f32.mrf.mxu1  ;;  %4291 = vmatmul.mubr.msk.bf16.gmra.mxu1 %vm543_vm4, %v5518_v7  ;;  %v1059_v8 = vpop.f32.mrf.mxu0 }
 0x12b   : > { %v5738_v48 = vadd.f32 %v1046_v41, %v873_v35  ;;  %v894_v47 = vadd.f32 %v4088_v17, %v5541_v58  ;;  %4294 = vmatprep.mubr.msk.bf16.mxu1 %vm543_vm4, %v5558_v1 }
 0x12c   : > { %v885_v33 = vpop.f32.mrf.mxu1  ;;  %v4123_v4 = vpop.f32.mrf.mxu0 }
 0x12d   : > { %v5743_v27 = vadd.f32 %v4122_v20, %v894_v47  ;;  %v886_v7 = vadd.f32 %v885_v33, %v5554_v5 }
 0x12e   : > { %v4089_v42 = vpop.f32.mrf.mxu1  ;;  %v1062_v40 = vpop.f32.mrf.mxu0 }
 0x12f   : > { %v5746_v21 = vadd.f32 %v1059_v8, %v886_v7  ;;  %v897_v13 = vadd.f32 %v4089_v42, %v5564_v61 }
 0x130   : > { %v888_v22 = vpop.f32.mrf.mxu1  ;;  %v4126_v18 = vpop.f32.mrf.mxu0  ;;  %4329 = vmatmul.mubr.msk.bf16.gmra.mxu0 %vm543_vm4, %v5596_v23 }
 0x131   : > { %v5751_v58 = vadd.f32 %v4123_v4, %v897_v13  ;;  %v889_v1 = vadd.f32 %v888_v22, %v5568_v6  ;;  %4332 = vmatprep.mubr.msk.bf16.mxu0 %vm543_vm4, %v3765_v9 }
 0x132   : > { %v4092_v38 = vpop.f32.mrf.mxu1  ;;  %4295 = vmatmul.mubr.msk.bf16.gmra.mxu1 %vm543_vm4, %v5560_v24  ;;  %v1075_v5 = vpop.f32.mrf.mxu0 }
 0x133   : > { %v5757_v41 = vadd.f32 %v1062_v40, %v889_v1  ;;  %v910_v61 = vadd.f32 %v4092_v38, %v5580_v2  ;;  %4298 = vmatprep.mubr.msk.bf16.mxu1 %vm543_vm4, %v5596_v23 }
 0x134   : > { %v901_v30 = vpop.f32.mrf.mxu1  ;;  %v4127_v46 = vpop.f32.mrf.mxu0 }
 0x135   : > { %v5762_v32 = vadd.f32 %v4126_v18, %v910_v61  ;;  %v902_v6 = vadd.f32 %v901_v30, %v5592_v26 }
 0x136   : > { %v4093_v12 = vpop.f32.mrf.mxu1  ;;  %v1078_v63 = vpop.f32.mrf.mxu0 }
 0x137   : > { %v5765_v39 = vadd.f32 %v1075_v5, %v902_v6  ;;  %v913_v24 = vadd.f32 %v4093_v12, %v5598_v19 }
 0x138   : > { %v904_v20 = vpop.f32.mrf.mxu1  ;;  %v4130_v35 = vpop.f32.mrf.mxu0  ;;  %4333 = vmatmul.mubr.msk.bf16.gmra.mxu0 %vm543_vm4, %v3784_v36 }
 0x139   : > { %v5772_v2 = vadd.f32 %v4127_v46, %v913_v24  ;;  %v905_v23 = vadd.f32 %v904_v20, %v5602_v59 }
 0x13a   : > { %v4096_v17 = vpop.f32.mrf.mxu1  ;;  %4299 = vmatmul.mubr.msk.bf16.gmra.mxu1 %vm543_vm4, %v3765_v9  ;;  %v1091_v26 = vpop.f32.mrf.mxu0 }
 0x13b   : > { %v5776_v8 = vadd.f32 %v1078_v63, %v905_v23  ;;  %v926_v56 = vadd.f32 %v4096_v17, %v5610_v53 }
 0x13c   : > { %v917_v19 = vpop.f32.mrf.mxu1  ;;  %v4131_v50 = vpop.f32.mrf.mxu0 }
 0x13d   : > { %v5779_v47 = vadd.f32 %v4130_v35, %v926_v56  ;;  %v918_v49 = vadd.f32 %v917_v19, %v5617_v43 }
 0x13e   : > { %v4097_v55 = vpop.f32.mrf.mxu1  ;;  %v1094_v36 = vpop.f32.mrf.mxu0 }
 0x13f   : > { %v5782_v33 = vadd.f32 %v1091_v26, %v918_v49  ;;  %v929_v59 = vadd.f32 %v4097_v55, %v5621_v57 }
 0x140   : > { %v920_v4 = vpop.f32.mrf.mxu1  ;;  %v4170_v7 = vpop.f32.mrf.mxu0 }
 0x141   : > { %v5785_v9 = vadd.f32 %v4131_v50, %v929_v59  ;;  %v921_v42 = vadd.f32 %v920_v4, %v5625_v16 }
 0x142   : > { %v4136_v40 = vpop.f32.mrf.mxu1  ;;  %v1888_v53 = vpop.f32.mrf.mxu0 }
 0x143   : > { %v5788_v13 = vadd.f32 %v1094_v36, %v921_v42  ;;  %v1789_v22 = vadd.f32 %v4136_v40, %v5636_v51 }
 0x144   : > { %v1660_v18 = vpop.f32.mrf.mxu1  ;;  %v4171_v43 = vpop.f32.mrf.mxu0 }
 0x145   : > { %v5791_v1 = vadd.f32 %v4170_v7, %v1789_v22  ;;  %v1787_v38 = vadd.f32 %v1660_v18, %v5639_v10 }
 0x146   : > { %v4137_v5 = vpop.f32.mrf.mxu1  ;;  %v1891_v57 = vpop.f32.mrf.mxu0 }
 0x147   : > { %v5794_v61 = vadd.f32 %v1888_v53, %v1787_v38  ;;  %v1790_v30 = vadd.f32 %v4137_v5, %v5644_v31 }
 0x148   : > { %v1663_v46 = vpop.f32.mrf.mxu1  ;;  %v4174_v16 = vpop.f32.mrf.mxu0 }
 0x149   : > { %v5797_v6 = vadd.f32 %v4171_v43, %v1790_v30  ;;  %v1788_v12 = vadd.f32 %v1663_v46, %v5651_v62 }
 0x14a   : > { %v4140_v63 = vpop.f32.mrf.mxu1  ;;  %v1904_v51 = vpop.f32.mrf.mxu0 }
 0x14b   : > { %v5800_v24 = vadd.f32 %v1891_v57, %v1788_v12  ;;  %v1793_v20 = vadd.f32 %v4140_v63, %v5656_v34 }
 0x14c   : > { %v1676_v35 = vpop.f32.mrf.mxu1  ;;  %v4175_v10 = vpop.f32.mrf.mxu0 }
 0x14d   : > { %v5803_v23 = vadd.f32 %v4174_v16, %v1793_v20  ;;  %v1791_v17 = vadd.f32 %v1676_v35, %v5659_v14 }
 0x14e   : > { %v4141_v26 = vpop.f32.mrf.mxu1  ;;  %v1907_v31 = vpop.f32.mrf.mxu0 }
 0x14f   : > { %v5806_v56 = vadd.f32 %v1904_v51, %v1791_v17  ;;  %v1794_v19 = vadd.f32 %v4141_v26, %v5664_v52 }
 0x150   : > { %v1679_v50 = vpop.f32.mrf.mxu1  ;;  %v4178_v62 = vpop.f32.mrf.mxu0 }
 0x151   : > { %v5809_v49 = vadd.f32 %v4175_v10, %v1794_v19  ;;  %v1792_v55 = vadd.f32 %v1679_v50, %v5671_v60 }
 0x152   : > { %v4144_v36 = vpop.f32.mrf.mxu1  ;;  %v1920_v34 = vpop.f32.mrf.mxu0 }
 0x153   : > { %v5812_v59 = vadd.f32 %v1907_v31, %v1792_v55  ;;  %v1797_v4 = vadd.f32 %v4144_v36, %v5676_v0 }
 0x154   : > { %v1692_v7 = vpop.f32.mrf.mxu1  ;;  %v4179_v14 = vpop.f32.mrf.mxu0 }
 0x155   : > { %v5815_v42 = vadd.f32 %v4178_v62, %v1797_v4  ;;  %v1795_v40 = vadd.f32 %v1692_v7, %v5679_v15 }
 0x156   : > { %v4145_v53 = vpop.f32.mrf.mxu1  ;;  %v1923_v52 = vpop.f32.mrf.mxu0 }
 0x157   : > { %v5818_v22 = vadd.f32 %v1920_v34, %v1795_v40  ;;  %v1798_v18 = vadd.f32 %v4145_v53, %v5684_v37 }
 0x158   : > { %v1695_v43 = vpop.f32.mrf.mxu1  ;;  %v4182_v60 = vpop.f32.mrf.mxu0 }
 0x159   : > { %v5821_v38 = vadd.f32 %v4179_v14, %v1798_v18  ;;  %v1796_v5 = vadd.f32 %v1695_v43, %v5691_v54 }
 0x15a   : > { %v4148_v57 = vpop.f32.mrf.mxu1  ;;  %v1936_v0 = vpop.f32.mrf.mxu0 }
 0x15b   : > { %v5824_v30 = vadd.f32 %v1923_v52, %v1796_v5  ;;  %v1801_v46 = vadd.f32 %v4148_v57, %v5696_v44 }
 0x15c   : > { %v1708_v16 = vpop.f32.mrf.mxu1  ;;  %v4183_v15 = vpop.f32.mrf.mxu0 }
 0x15d   : > { %v5827_v12 = vadd.f32 %v4182_v60, %v1801_v46  ;;  %v1799_v63 = vadd.f32 %v1708_v16, %v5699_v28 }
 0x15e   : > { %v4149_v51 = vpop.f32.mrf.mxu1  ;;  %v1939_v37 = vpop.f32.mrf.mxu0 }
 0x15f   : > { %v5830_v20 = vadd.f32 %v1936_v0, %v1799_v63  ;;  %v1802_v35 = vadd.f32 %v4149_v51, %v5704_v25 }
 0x160   : > { %v1711_v10 = vpop.f32.mrf.mxu1  ;;  %v4186_v54 = vpop.f32.mrf.mxu0 }
 0x161   : > { %v5833_v17 = vadd.f32 %v4183_v15, %v1802_v35  ;;  %v1800_v26 = vadd.f32 %v1711_v10, %v5712_v3 }
 0x162   : > { %v4152_v31 = vpop.f32.mrf.mxu1  ;;  %v1952_v44 = vpop.f32.mrf.mxu0 }
 0x163   : > { %v5836_v19 = vadd.f32 %v1939_v37, %v1800_v26  ;;  %v1805_v50 = vadd.f32 %v4152_v31, %v5717_v45 }
 0x164   : > { %v1724_v62 = vpop.f32.mrf.mxu1  ;;  %v4187_v28 = vpop.f32.mrf.mxu0 }
 0x165   : > { %v5839_v55 = vadd.f32 %v4186_v54, %v1805_v50  ;;  %v1803_v36 = vadd.f32 %v1724_v62, %v5722_v29 }
 0x166   : > { %v4153_v34 = vpop.f32.mrf.mxu1  ;;  %v1955_v25 = vpop.f32.mrf.mxu0 }
 0x167   : > { %v5842_v4 = vadd.f32 %v1952_v44, %v1803_v36  ;;  %v1806_v7 = vadd.f32 %v4153_v34, %v5727_v11 }
 0x168   : > { %v1727_v14 = vpop.f32.mrf.mxu1  ;;  %v4190_v3 = vpop.f32.mrf.mxu0 }
 0x169   : > { %v5845_v40 = vadd.f32 %v4187_v28, %v1806_v7  ;;  %v1804_v53 = vadd.f32 %v1727_v14, %v5738_v48 }
 0x16a   : > { %v4156_v52 = vpop.f32.mrf.mxu1  ;;  %v1968_v45 = vpop.f32.mrf.mxu0 }
 0x16b   : > { %6411 = vst [vmem:[#allocation14_spill] sm:$0xff] %v5845_v40  ;;  %v5848_v18 = vadd.f32 %v1955_v25, %v1804_v53  ;;  %v1809_v43 = vadd.f32 %v4156_v52, %v5743_v27 }
 0x16c   : > { %v1740_v60 = vpop.f32.mrf.mxu1  ;;  %v4191_v29 = vpop.f32.mrf.mxu0 }
 0x16d   : > { %6412 = vst [vmem:[#allocation15_spill] sm:$0xff] %v5848_v18  ;;  %v5851_v5 = vadd.f32 %v4190_v3, %v1809_v43  ;;  %v1807_v57 = vadd.f32 %v1740_v60, %v5746_v21 }
 0x16e   : > { %v4157_v0 = vpop.f32.mrf.mxu1  ;;  %v1971_v11 = vpop.f32.mrf.mxu0 }
 0x16f   : > { %6413 = vst [vmem:[#allocation16_spill] sm:$0xff] %v5851_v5  ;;  %v5854_v46 = vadd.f32 %v1968_v45, %v1807_v57  ;;  %v1810_v16 = vadd.f32 %v4157_v0, %v5751_v58 }
 0x170   : > { %v1743_v15 = vpop.f32.mrf.mxu1  ;;  %v4194_v48 = vpop.f32.mrf.mxu0 }
 0x171   : > { %6414 = vst [vmem:[#allocation17_spill] sm:$0xff] %v5854_v46  ;;  %v5857_v63 = vadd.f32 %v4191_v29, %v1810_v16  ;;  %v1808_v51 = vadd.f32 %v1743_v15, %v5757_v41 }
 0x172   : > { %v4160_v37 = vpop.f32.mrf.mxu1  ;;  %v1984_v27 = vpop.f32.mrf.mxu0 }
 0x173   : > { %6415 = vst [vmem:[#allocation6_spill] sm:$0xff] %v5857_v63  ;;  %v5860_v35 = vadd.f32 %v1971_v11, %v1808_v51  ;;  %v1813_v10 = vadd.f32 %v4160_v37, %v5762_v32 }
 0x174   : > { %v1756_v54 = vpop.f32.mrf.mxu1  ;;  %v4195_v21 = vpop.f32.mrf.mxu0 }
 0x175   : > { %6416 = vst [vmem:[#allocation5_spill] sm:$0xff] %v5860_v35  ;;  %v5863_v26 = vadd.f32 %v4194_v48, %v1813_v10  ;;  %v1811_v31 = vadd.f32 %v1756_v54, %v5765_v39 }
 0x176   : > { %v4161_v44 = vpop.f32.mrf.mxu1  ;;  %v1987_v58 = vpop.f32.mrf.mxu0 }
 0x177   : > { %6417 = vst [vmem:[#allocation18_spill] sm:$0xff] %v5863_v26  ;;  %v5866_v50 = vadd.f32 %v1984_v27, %v1811_v31  ;;  %v1814_v62 = vadd.f32 %v4161_v44, %v5772_v2 }
 0x178   : > { %v1759_v28 = vpop.f32.mrf.mxu1  ;;  %v4198_v41 = vpop.f32.mrf.mxu0 }
 0x179   : > { %6418 = vst [vmem:[#allocation20_spill] sm:$0xff] %v5866_v50  ;;  %v5869_v36 = vadd.f32 %v4195_v21, %v1814_v62  ;;  %v1812_v34 = vadd.f32 %v1759_v28, %v5776_v8 }
 0x17a   : > { %v4164_v25 = vpop.f32.mrf.mxu1  ;;  %v2000_v32 = vpop.f32.mrf.mxu0 }
 0x17b   : > { %6419 = vst [vmem:[#allocation8_spill] sm:$0xff] %v5869_v36  ;;  %v5872_v7 = vadd.f32 %v1987_v58, %v1812_v34  ;;  %v1817_v14 = vadd.f32 %v4164_v25, %v5779_v47 }
 0x17c   : > { %v1772_v3 = vpop.f32.mrf.mxu1  ;;  %v4199_v39 = vpop.f32.mrf.mxu0 }
 0x17d   : > { %6420 = vst [vmem:[#allocation10_spill] sm:$0xff] %v5872_v7  ;;  %v5875_v53 = vadd.f32 %v4198_v41, %v1817_v14  ;;  %v1815_v52 = vadd.f32 %v1772_v3, %v5782_v33 }
 0x17e   : > { %v4165_v45 = vpop.f32.mrf.mxu1  ;;  %v2003_v2 = vpop.f32.mrf.mxu0 }
 0x17f   : > { %6421 = vst [vmem:[#allocation7_spill] sm:$0xff] %v5875_v53  ;;  %v5878_v43 = vadd.f32 %v2000_v32, %v1815_v52  ;;  %v1818_v60 = vadd.f32 %v4165_v45, %v5785_v9 }
 0x180   : > { %v1775_v29 = vpop.f32.mrf.mxu1  ;;  %v5881_v8 = vpop.f32.mrf.mxu0 }
 0x181   : > { %6422 = vst [vmem:[#allocation21_spill] sm:$0xff] %v5878_v43  ;;  %v5883_v57 = vadd.f32 %v4199_v39, %v1818_v60  ;;  %v1816_v0 = vadd.f32 %v1775_v29, %v5788_v13 }
 0x182   : > { %v4204_v47 = vpop.f32.mrf.mxu1  ;;  %v5886_v11 = vpop.f32.mrf.mxu0 }
 0x183   : > { %6423 = vst [vmem:[#allocation9_spill] sm:$0xff] %v5883_v57  ;;  %v5888_v16 = vadd.f32 %v2003_v2, %v1816_v0 }
 0x184   : > { %v2116_v15 = vpop.f32.mrf.mxu1  ;;  %v5890_v33 = vpop.f32.mrf.mxu0 }
 0x185   : > { %6424 = vst [vmem:[#allocation19_spill] sm:$0xff] %v5888_v16 }
 0x186   : > { %v4205_v48 = vpop.f32.mrf.mxu1  ;;  %v5892_v51 = vpop.f32.mrf.mxu0 }
 0x188   : > { %v2119_v37 = vpop.f32.mrf.mxu1  ;;  %v5894_v9 = vpop.f32.mrf.mxu0 }
 0x18a   : > { %v4208_v27 = vpop.f32.mrf.mxu1  ;;  %v5896_v10 = vpop.f32.mrf.mxu0 }
 0x18c   : > { %v2132_v54 = vpop.f32.mrf.mxu1  ;;  %v5898_v21 = vpop.f32.mrf.mxu0 }
 0x18e   : > { %v4209_v13 = vpop.f32.mrf.mxu1  ;;  %v5900_v31 = vpop.f32.mrf.mxu0 }
 0x190   : > { %v2135_v44 = vpop.f32.mrf.mxu1  ;;  %v5902_v58 = vpop.f32.mrf.mxu0 }
 0x192   : > { %v4212_v62 = vpop.f32.mrf.mxu1  ;;  %v5904_v28 = vpop.f32.mrf.mxu0 }
 0x194   : > { %v2148_v41 = vpop.f32.mrf.mxu1  ;;  %v5906_v34 = vpop.f32.mrf.mxu0 }
 0x196   : > { %v4213_v25 = vpop.f32.mrf.mxu1  ;;  %v5908_v32 = vpop.f32.mrf.mxu0 }
 0x198   : > { %v5910_v14 = vpop.f32.mrf.mxu1  ;;  %v5912_v3 = vpop.f32.mrf.mxu0 }
 0x19a   : > { %v4216_v39 = vpop.f32.mrf.mxu1  ;;  %v5914_v52 = vpop.f32.mrf.mxu0 }
 0x19c   : > { %v2164_v45 = vpop.f32.mrf.mxu1  ;;  %v5916_v2 = vpop.f32.mrf.mxu0 }
 0x19e   : > { %v4217_v60 = vpop.f32.mrf.mxu1  ;;  %v5918_v29 = vpop.f32.mrf.mxu0 }
 0x1a0   : > { %v5920_v0 = vpop.f32.mrf.mxu1  ;;  %v5922_v16 = vpop.f32.mrf.mxu0 }
 0x1a2   : > { %v5924_v57 = vpop.f32.mrf.mxu1  ;;  %v5926_v43 = vpop.f32.mrf.mxu0 }
 0x1a3   : > { %6425 = vst [vmem:[#allocation12_spill] sm:$0xff] %v5926_v43 }
 0x1a4   : > { %v5928_v53 = vpop.f32.mrf.mxu1  ;;  %v5930_v7 = vpop.f32.mrf.mxu0 }
 0x1a5   : > { %6426 = vst [vmem:[#allocation11_spill] sm:$0xff] %v5930_v7 }
 0x1a6   : > { %v5932_v36 = vpop.f32.mrf.mxu1  ;;  %v5934_v50 = vpop.f32.mrf.mxu0 }
 0x1a7   : > { %6427 = vst [vmem:[#allocation13_spill] sm:$0xff] %v5932_v36  ;;  %6428 = vst [vmem:[#allocation22_spill] sm:$0xff] %v5934_v50 }
 0x1a8   : > { %v5936_v26 = vpop.f32.mrf.mxu1  ;;  %v5938_v35 = vpop.f32.mrf.mxu0 }
 0x1a9   : > { %6429 = vst [vmem:[#allocation23_spill] sm:$0xff] %v5936_v26  ;;  %6430 = vst [vmem:[#allocation24_spill] sm:$0xff] %v5938_v35 }
 0x1aa   : > { %v5940_v63 = vpop.f32.mrf.mxu1  ;;  %v5942_v46 = vpop.f32.mrf.mxu0 }
 0x1ab   : > { %6431 = vst [vmem:[#allocation25_spill] sm:$0xff] %v5940_v63  ;;  %6432 = vst [vmem:[#allocation26_spill] sm:$0xff] %v5942_v46 }
 0x1ac   : > { %v5944_v5 = vpop.f32.mrf.mxu1  ;;  %v5946_v18 = vpop.f32.mrf.mxu0 }
 0x1ad   : > { %6433 = vst [vmem:[#allocation27_spill] sm:$0xff] %v5944_v5  ;;  %6434 = vst [vmem:[#allocation28_spill] sm:$0xff] %v5946_v18 }
 0x1ae   : > { %v5948_v43 = vpop.f32.mrf.mxu1  ;;  %v5950_v40 = vpop.f32.mrf.mxu0 }
 0x1af   : > { %6435 = vst [vmem:[#allocation29_spill] sm:$0xff] %v5948_v43  ;;  %6436 = vst [vmem:[#allocation30_spill] sm:$0xff] %v5950_v40 }
 0x1b0   : > { %v5952_v7 = vpop.f32.mrf.mxu1  ;;  %v5954_v36 = vpop.f32.mrf.mxu0 }
 0x1b1   : > { %6437 = vst [vmem:[#allocation31_spill] sm:$0xff] %v5952_v7  ;;  %6438 = vst [vmem:[#allocation32_spill] sm:$0xff] %v5954_v36 }
 0x1b2   : > { %v5956_v50 = vpop.f32.mrf.mxu1  ;;  %v5958_v26 = vpop.f32.mrf.mxu0 }
 0x1b3   : > { %6439 = vst [vmem:[#allocation33_spill] sm:$0xff] %v5956_v50  ;;  %6440 = vst [vmem:[#allocation34_spill] sm:$0xff] %v5958_v26  ;;  %v2245_v26 = vadd.f32 %v4204_v47, %v5791_v1 }
 0x1b4   : > { %v5960_v35 = vpop.f32.mrf.mxu1  ;;  %v5962_v63 = vpop.f32.mrf.mxu0 }
 0x1b5   : > { %6441 = vst [vmem:[#allocation35_spill] sm:$0xff] %v5960_v35  ;;  %6442 = vst [vmem:[#allocation36_spill] sm:$0xff] %v5962_v63  ;;  %v2243_v63 = vadd.f32 %v2116_v15, %v5794_v61  ;;  %v2250_v61 = vadd.f32 %v4209_v13, %v5809_v49  ;;  %v2253_v15 = vadd.f32 %v4212_v62, %v5815_v42 }
 0x1b6   : > { %v5964_v46 = vpop.f32.mrf.mxu1  ;;  %v5966_v5 = vpop.f32.mrf.mxu0  ;;  %v2255_v42 = vadd.f32 %v2164_v45, %v5830_v20  ;;  %v6451_v45 = vld [vmem:[#allocation14_spill] sm:$0xff] }
 0x1b7   : > { %6443 = vst [vmem:[#allocation37_spill] sm:$0xff] %v5964_v46  ;;  %6444 = vst [vmem:[#allocation38_spill] sm:$0xff] %v5966_v5  ;;  %v2246_v46 = vadd.f32 %v4205_v48, %v5797_v6  ;;  %v2244_v5 = vadd.f32 %v2119_v37, %v5800_v24  ;;  %v2668_v1 = vadd.f32 %v5886_v11, %v2243_v63 }
 0x1b8   : > { %v5968_v18 = vpop.f32.mrf.mxu1  ;;  %v5970_v43 = vpop.f32.mrf.mxu0  ;;  %v2248_v6 = vadd.f32 %v2135_v44, %v5812_v59  ;;  %v2254_v63 = vadd.f32 %v4213_v25, %v5821_v38  ;;  %v2252_v59 = vadd.f32 %v5910_v14, %v5824_v30  ;;  %v2675_v38 = vadd.f32 %v5898_v21, %v2250_v61 }
 0x1b9   : > { %6445 = vst [vmem:[#allocation39_spill] sm:$0xff] %v5968_v18  ;;  %6446 = vst [vmem:[#allocation40_spill] sm:$0xff] %v5970_v43  ;;  %v2249_v43 = vadd.f32 %v4208_v27, %v5803_v23  ;;  %v2671_v24 = vadd.f32 %v5890_v33, %v2246_v46  ;;  %v2669_v47 = vadd.f32 %v5892_v51, %v2244_v5  ;;  %v6011_v46 = vld [vmem:[%s6331_s4] ss:$0 sm:$0xff] }
 0x1ba   : > { %v5972_v40 = vpop.f32.mrf.mxu1  ;;  %v5974_v7 = vpop.f32.mrf.mxu0  ;;  %v2251_v23 = vadd.f32 %v2148_v41, %v5818_v22  ;;  %v2257_v5 = vadd.f32 %v4216_v39, %v5827_v12  ;;  %v2258_v22 = vadd.f32 %v4217_v60, %v5833_v17  ;;  %v6019_v12 = vadd.f32 %v5902_v58, %v2253_v15  ;;  %v6031_v33 = vld [vmem:[%s6332_s5] ss:$0 sm:$0xff] }
 0x1bb   : > { %6447 = vst [vmem:[#allocation41_spill] sm:$0xff] %v5972_v40  ;;  %6448 = vst [vmem:[#allocation42_spill] sm:$0xff] %v5974_v7  ;;  %v2247_v7 = vadd.f32 %v2132_v54, %v5806_v56  ;;  %v2674_v37 = vadd.f32 %v5894_v9, %v2249_v43  ;;  %v2256_v17 = vadd.f32 %v5920_v0, %v5836_v19 }
 0x1bc   : > { %v5976_v36 = vpop.f32.mrf.mxu1  ;;  %v5978_v50 = vpop.f32.mrf.mxu0  ;;  %v6022_v20 = vadd.f32 %v5904_v28, %v2251_v23  ;;  %v2261_v11 = vadd.f32 %v5924_v57, %v5839_v55  ;;  %v6034_v9 = vadd.f32 %v5906_v34, %v2254_v63  ;;  %v6038_v21 = vadd.f32 %v5908_v32, %v2252_v59  ;;  %v6454_v63 = vld [vmem:[#allocation15_spill] sm:$0xff] }
 0x1bd   : > { %6449 = vst [vmem:[#allocation43_spill] sm:$0xff] %v5976_v36  ;;  %6450 = vst [vmem:[#allocation44_spill] sm:$0xff] %v5978_v50  ;;  %v2670_v50 = vadd.f32 %v5881_v8, %v2245_v26  ;;  %v2672_v26 = vadd.f32 %v5896_v10, %v2247_v7  ;;  %v6041_v19 = vadd.f32 %v5912_v3, %v2257_v5 }
 0x1be   : > { %v5984_v35 = vpop.f32.mrf.mxu1  ;;  %v5986_v18 = vpop.f32.mrf.mxu0  ;;  %v6044_v55 = vadd.f32 %v5914_v52, %v2255_v42  ;;  %v6047_v57 = vadd.f32 %v5916_v2, %v2258_v22  ;;  %v6054_v28 = vadd.f32 %v5918_v29, %v2256_v17  ;;  %v6057_v41 = vadd.f32 %v5922_v16, %v2261_v11  ;;  %v6452_v2 = vld [vmem:[#allocation13_spill] sm:$0xff]  ;;  %v6456_v17 = vld [vmem:[#allocation11_spill] sm:$0xff] }
 0x1bf   : > { %v2259_v34 = vadd.f32 %v5928_v53, %v5842_v4  ;;  %v2262_v60 = vadd.f32 %v6452_v2, %v6451_v45 }
 0x1c0   : > { %v5990_v40 = vpop.f32.mrf.mxu1  ;;  %v4306_v36 = vpop.f32.mrf.mxu0 }
 0x1c1   : > { %v6081_v11 = vadd.f32 %v6456_v17, %v2262_v60 }
 0x1c2   : > { %v4272_v56 = vpop.f32.mrf.mxu1  ;;  %v2965_v48 = vpop.f32.mrf.mxu0 }
 0x1c3   : > { %v2882_v49 = vadd.f32 %v4272_v56, %v2670_v50  ;;  %v6015_v50 = vadd.f32 %v5900_v31, %v2248_v6 }
 0x1c4   : > { %v2753_v43 = vpop.f32.mrf.mxu1  ;;  %v4307_v7 = vpop.f32.mrf.mxu0 }
 0x1c5   : > { %v3094_v30 = vadd.f32 %v4306_v36, %v2882_v49  ;;  %v2880_v8 = vadd.f32 %v2753_v43, %v2668_v1  ;;  %v6455_v49 = vld [vmem:[#allocation23_spill] sm:$0xff] }
 0x1c6   : > { %v4273_v36 = vpop.f32.mrf.mxu1  ;;  %v2968_v51 = vpop.f32.mrf.mxu0  ;;  %v2260_v59 = vadd.f32 %v6455_v49, %v6454_v63 }
 0x1c7   : > { %v3133_v27 = vadd.f32 %v6011_v46, %v3094_v30  ;;  %v3092_v10 = vadd.f32 %v2965_v48, %v2880_v8  ;;  %v2883_v54 = vadd.f32 %v4273_v36, %v2671_v24  ;;  %v6453_v24 = vld [vmem:[#allocation12_spill] sm:$0xff] }
 0x1c8   : > { %v2756_v13 = vpop.f32.mrf.mxu1  ;;  %v4310_v31 = vpop.f32.mrf.mxu0 }
 0x1c9   : > { %vm3165_vm10 = vcmp.ge.f32.partialorder %v3133_v27, 0.0  ;;  %v3204_v44 = vmul.f32 %v6031_v33, %v3133_v27  ;;  %v3131_v58 = vadd.f32 %v6011_v46, %v3092_v10  ;;  %v3095_v62 = vadd.f32 %v4307_v7, %v2883_v54  ;;  %v6457_v10 = vld [vmem:[#allocation16_spill] sm:$0xff] }
 0x1ca   : > { %v2881_v25 = vadd.f32 %v2756_v13, %v2669_v47  ;;  %v4276_v32 = vpop.f32.mrf.mxu1  ;;  %v2981_v14 = vpop.f32.mrf.mxu0  ;;  %v6067_v47 = vadd.f32 %v6453_v24, %v2259_v34  ;;  %v6461_v24 = vld [vmem:[#allocation17_spill] sm:$0xff] }
 0x1cb   : > { %v3236_v3 = vsel %vm3165_vm10, %v3133_v27, %v3204_v44  ;;  %vm3163_vm11 = vcmp.ge.f32.partialorder %v3131_v58, 0.0  ;;  %v3202_v39 = vmul.f32 %v6031_v33, %v3131_v58  ;;  %v3134_v52 = vadd.f32 %v6011_v46, %v3095_v62 }
 0x1cc   : > { %v3846_v29 = vpack.c.bf16 %v3236_v3, %v3236_v3  ;;  %v3093_v0 = vadd.f32 %v2968_v51, %v2881_v25  ;;  %v2886_v1 = vadd.f32 %v4276_v32, %v2674_v37  ;;  %v2769_v16 = vpop.f32.mrf.mxu1  ;;  %v4311_v61 = vpop.f32.mrf.mxu0  ;;  %v6459_v32 = vld [vmem:[#allocation22_spill] sm:$0xff] }
 0x1cd   : > { %v3234_v6 = vsel %vm3163_vm11, %v3131_v58, %v3202_v39  ;;  %vm3166_vm12 = vcmp.ge.f32.partialorder %v3134_v52, 0.0  ;;  %v3205_v4 = vmul.f32 %v6031_v33, %v3134_v52  ;;  %v2884_v53 = vadd.f32 %v2769_v16, %v2672_v26 }
 0x1ce   : > { %3397 = vst.msk [vmem:[%s6069_s28 + $0x8] sm:$0xf] %vm3394_vm9, %v3846_v29  ;;  %v3844_v15 = vpack.c.bf16 %v3234_v6, %v3234_v6  ;;  %v3132_v23 = vadd.f32 %v6011_v46, %v3093_v0  ;;  %v3098_v56 = vadd.f32 %v4310_v31, %v2886_v1  ;;  %v4277_v48 = vpop.f32.mrf.mxu1  ;;  %v2984_v37 = vpop.f32.mrf.mxu0 }
 0x1cf   : > { %v3237_v26 = vsel %vm3166_vm12, %v3134_v52, %v3205_v4  ;;  %v3096_v5 = vadd.f32 %v2981_v14, %v2884_v53  ;;  %v2887_v42 = vadd.f32 %v4277_v48, %v2675_v38  ;;  %v6458_v38 = vld [vmem:[#allocation25_spill] sm:$0xff] }
 0x1d0   : > { %3395 = vst.msk [vmem:[%s6069_s28] sm:$0xf] %vm3394_vm9, %v3844_v15  ;;  %v3847_v22 = vpack.c.bf16 %v3237_v26, %v3237_v26  ;;  %vm3164_vm13 = vcmp.ge.f32.partialorder %v3132_v23, 0.0  ;;  %v3203_v43 = vmul.f32 %v6031_v33, %v3132_v23  ;;  %v3137_v7 = vadd.f32 %v6011_v46, %v3098_v56  ;;  %v2772_v30 = vpop.f32.mrf.mxu1  ;;  %v4314_v8 = vpop.f32.mrf.mxu0  ;;  %v6462_v15 = vld [vmem:[#allocation27_spill] sm:$0xff]  ;;  %v6463_v26 = vld [vmem:[#allocation6_spill] sm:$0xff] }
 0x1d1   : > { %v3135_v36 = vadd.f32 %v6011_v46, %v3096_v5  ;;  %v3099_v51 = vadd.f32 %v4311_v61, %v2887_v42  ;;  %v2885_v27 = vadd.f32 %v2772_v30, %v6015_v50  ;;  %v2265_v54 = vadd.f32 %v6458_v38, %v6457_v10  ;;  %v6464_v5 = vld [vmem:[#allocation29_spill] sm:$0xff] }
 0x1d2   : > { %3398 = vst.msk [vmem:[%s6069_s28 + $0xc] sm:$0xf] %vm3394_vm9, %v3847_v22  ;;  %v3235_v13 = vsel %vm3164_vm13, %v3132_v23, %v3203_v43  ;;  %vm3169_vm14 = vcmp.ge.f32.partialorder %v3137_v7, 0.0  ;;  %v3208_v31 = vmul.f32 %v6031_v33, %v3137_v7  ;;  %v4280_v44 = vpop.f32.mrf.mxu1  ;;  %v2997_v58 = vpop.f32.mrf.mxu0  ;;  %v6093_v50 = vadd.f32 %v6459_v32, %v2260_v59  ;;  %v6465_v30 = vld [vmem:[#allocation5_spill] sm:$0xff] }
 0x1d3   : > { %v3845_v62 = vpack.c.bf16 %v3235_v13, %v3235_v13  ;;  %vm3167_vm15 = vcmp.ge.f32.partialorder %v3135_v36, 0.0  ;;  %v3206_v34 = vmul.f32 %v6031_v33, %v3135_v36  ;;  %v3138_v25 = vadd.f32 %v6011_v46, %v3099_v51 }
 0x1d4   : > { %v3240_v14 = vsel %vm3169_vm14, %v3137_v7, %v3208_v31  ;;  %v3097_v3 = vadd.f32 %v2984_v37, %v2885_v27  ;;  %v2890_v39 = vadd.f32 %v4280_v44, %v6019_v12  ;;  %v2785_v52 = vpop.f32.mrf.mxu1  ;;  %v4315_v45 = vpop.f32.mrf.mxu0  ;;  %v6460_v12 = vld [vmem:[#allocation24_spill] sm:$0xff]  ;;  %v2263_v23 = vadd.f32 %v6462_v15, %v6461_v24  ;;  %v6467_v31 = vld [vmem:[#allocation26_spill] sm:$0xff] }
 0x1d5   : > { %3396 = vst.msk [vmem:[%s6069_s28 + $0x4] sm:$0xf] %vm3394_vm9, %v3845_v62  ;;  %v3850_v2 = vpack.c.bf16 %v3240_v14, %v3240_v14  ;;  %v3238_v60 = vsel %vm3167_vm15, %v3135_v36, %v3206_v34  ;;  %vm3170_vm0 = vcmp.ge.f32.partialorder %v3138_v25, 0.0  ;;  %v3209_v29 = vmul.f32 %v6031_v33, %v3138_v25  ;;  %v6468_v44 = vld [vmem:[#allocation18_spill] sm:$0xff] }
 0x1d6   : > { %v3848_v0 = vpack.c.bf16 %v3238_v60, %v3238_v60  ;;  %v3136_v1 = vadd.f32 %v6011_v46, %v3097_v3  ;;  %v3102_v16 = vadd.f32 %v4314_v8, %v2890_v39  ;;  %v2888_v61 = vadd.f32 %v2785_v52, %v6022_v20  ;;  %v4281_v6 = vpop.f32.mrf.mxu1  ;;  %v3000_v4 = vpop.f32.mrf.mxu0  ;;  %v6466_v8 = vld [vmem:[#allocation31_spill] sm:$0xff] }
 0x1d7   : > { %v6102_v53 = vadd.f32 %v6460_v12, %v2265_v54  ;;  %3401 = vst.msk [vmem:[%s6069_s28 + $0x18] sm:$0xf] %vm3394_vm9, %v3850_v2  ;;  %v3241_v56 = vsel %vm3170_vm0, %v3138_v25, %v3209_v29  ;;  %v2891_v48 = vadd.f32 %v4281_v6, %v6034_v9  ;;  %v2266_v42 = vadd.f32 %v6464_v5, %v6463_v26  ;;  %v6474_v26 = vld [vmem:[#allocation35_spill] sm:$0xff] }
 0x1d8   : > { %3399 = vst.msk [vmem:[%s6069_s28 + $0x10] sm:$0xf] %vm3394_vm9, %v3848_v0  ;;  %v3851_v37 = vpack.c.bf16 %v3241_v56, %v3241_v56  ;;  %vm3168_vm1 = vcmp.ge.f32.partialorder %v3136_v1, 0.0  ;;  %v3207_v20 = vmul.f32 %v6031_v33, %v3136_v1  ;;  %v3141_v63 = vadd.f32 %v6011_v46, %v3102_v16  ;;  %v2788_v49 = vpop.f32.mrf.mxu1  ;;  %v4318_v59 = vpop.f32.mrf.mxu0  ;;  %v6471_v16 = vld [vmem:[#allocation30_spill] sm:$0xff] }
 0x1d9   : > { %v3100_v22 = vadd.f32 %v2997_v58, %v2888_v61  ;;  %v3103_v43 = vadd.f32 %v4315_v45, %v2891_v48  ;;  %v2889_v7 = vadd.f32 %v2788_v49, %v6038_v21  ;;  %v2264_v9 = vadd.f32 %v6466_v8, %v6465_v30  ;;  %v6469_v58 = vld [vmem:[#allocation33_spill] sm:$0xff] }
 0x1da   : > { %3402 = vst.msk [vmem:[%s6069_s28 + $0x1c] sm:$0xf] %vm3394_vm9, %v3851_v37  ;;  %v3239_v17 = vsel %vm3168_vm1, %v3136_v1, %v3207_v20  ;;  %vm3173_vm2 = vcmp.ge.f32.partialorder %v3141_v63, 0.0  ;;  %v3212_v36 = vmul.f32 %v6031_v33, %v3141_v63  ;;  %v4284_v51 = vpop.f32.mrf.mxu1  ;;  %v3013_v27 = vpop.f32.mrf.mxu0  ;;  %v6124_v21 = vadd.f32 %v6467_v31, %v2263_v23 }
 0x1db   : > { %v3849_v10 = vpack.c.bf16 %v3239_v17, %v3239_v17  ;;  %v3139_v38 = vadd.f32 %v6011_v46, %v3100_v22  ;;  %v3142_v54 = vadd.f32 %v6011_v46, %v3103_v43  ;;  %v3101_v13 = vadd.f32 %v3000_v4, %v2889_v7  ;;  %v6476_v17 = vld [vmem:[#allocation37_spill] sm:$0xff] }
 0x1dc   : > { %v2269_v62 = vadd.f32 %v6469_v58, %v6468_v44  ;;  %v3244_v34 = vsel %vm3173_vm2, %v3141_v63, %v3212_v36  ;;  %v2894_v25 = vadd.f32 %v4284_v51, %v6041_v19  ;;  %v2801_v32 = vpop.f32.mrf.mxu1  ;;  %v4319_v14 = vpop.f32.mrf.mxu0  ;;  %v6470_v19 = vld [vmem:[#allocation28_spill] sm:$0xff]  ;;  %v6139_v61 = vadd.f32 %v6471_v16, %v2264_v9  ;;  %v6477_v16 = vld [vmem:[#allocation10_spill] sm:$0xff] }
 0x1dd   : > { %3400 = vst.msk [vmem:[%s6069_s28 + $0x14] sm:$0xf] %vm3394_vm9, %v3849_v10  ;;  %v3854_v3 = vpack.c.bf16 %v3244_v34, %v3244_v34  ;;  %vm3171_vm3 = vcmp.ge.f32.partialorder %v3139_v38, 0.0  ;;  %v3210_v39 = vmul.f32 %v6031_v33, %v3139_v38  ;;  %vm3174_vm4 = vcmp.ge.f32.partialorder %v3142_v54, 0.0  ;;  %v6472_v63 = vld [vmem:[#allocation32_spill] sm:$0xff] }
 0x1de   : > { %v3213_v52 = vmul.f32 %v6031_v33, %v3142_v54  ;;  %v3140_v45 = vadd.f32 %v6011_v46, %v3101_v13  ;;  %v3106_v2 = vadd.f32 %v4318_v59, %v2894_v25  ;;  %v2892_v60 = vadd.f32 %v2801_v32, %v6044_v55  ;;  %v4285_v29 = vpop.f32.mrf.mxu1  ;;  %v3016_v0 = vpop.f32.mrf.mxu0  ;;  %v6473_v59 = vld [vmem:[#allocation20_spill] sm:$0xff] }
 0x1df   : > { %v6136_v1 = vadd.f32 %v6470_v19, %v2266_v42  ;;  %3405 = vst.msk [vmem:[%s6069_s28 + $0x28] sm:$0xf] %vm3394_vm9, %v3854_v3  ;;  %v3242_v6 = vsel %vm3171_vm3, %v3139_v38, %v3210_v39  ;;  %v2895_v4 = vadd.f32 %v4285_v29, %v6047_v57  ;;  %v6147_v49 = vadd.f32 %v6472_v63, %v2269_v62  ;;  %v6475_v9 = vld [vmem:[#allocation8_spill] sm:$0xff] }
 0x1e0   : > { %v3852_v12 = vpack.c.bf16 %v3242_v6, %v3242_v6  ;;  %v3245_v24 = vsel %vm3174_vm4, %v3142_v54, %v3213_v52  ;;  %vm3172_vm5 = vcmp.ge.f32.partialorder %v3140_v45, 0.0  ;;  %v3211_v55 = vmul.f32 %v6031_v33, %v3140_v45  ;;  %v2804_v15 = vpop.f32.mrf.mxu1  ;;  %v4322_v23 = vpop.f32.mrf.mxu0  ;;  %v6478_v6 = vld [vmem:[#allocation39_spill] sm:$0xff] }
 0x1e1   : > { %v3855_v56 = vpack.c.bf16 %v3245_v24, %v3245_v24  ;;  %v3145_v48 = vadd.f32 %v6011_v46, %v3106_v2  ;;  %v3104_v37 = vadd.f32 %v3013_v27, %v2892_v60  ;;  %v3107_v20 = vadd.f32 %v4319_v14, %v2895_v4 }
 0x1e2   : > { %v2267_v5 = vadd.f32 %v6474_v26, %v6473_v59  ;;  %3403 = vst.msk [vmem:[%s6069_s28 + $0x20] sm:$0xf] %vm3394_vm9, %v3852_v12  ;;  %v3243_v57 = vsel %vm3172_vm5, %v3140_v45, %v3211_v55  ;;  %v2893_v42 = vadd.f32 %v2804_v15, %v6054_v28  ;;  %v4288_v22 = vpop.f32.mrf.mxu1  ;;  %v3029_v43 = vpop.f32.mrf.mxu0  ;;  %v2270_v36 = vadd.f32 %v6476_v17, %v6475_v9  ;;  %v6480_v12 = vld [vmem:[#allocation41_spill] sm:$0xff] }
 0x1e3   : > { %3406 = vst.msk [vmem:[%s6069_s28 + $0x2c] sm:$0xf] %vm3394_vm9, %v3855_v56  ;;  %v3853_v7 = vpack.c.bf16 %v3243_v57, %v3243_v57  ;;  %vm3177_vm6 = vcmp.ge.f32.partialorder %v3145_v48, 0.0  ;;  %v3216_v30 = vmul.f32 %v6031_v33, %v3145_v48  ;;  %v3143_v8 = vadd.f32 %v6011_v46, %v3104_v37 }
 0x1e4   : > { %v3146_v51 = vadd.f32 %v6011_v46, %v3107_v20  ;;  %v3105_v27 = vadd.f32 %v3016_v0, %v2893_v42  ;;  %v2898_v10 = vadd.f32 %v4288_v22, %v6057_v41  ;;  %v2817_v38 = vpop.f32.mrf.mxu1  ;;  %v4323_v28 = vpop.f32.mrf.mxu0  ;;  %v2268_v4 = vadd.f32 %v6478_v6, %v6477_v16 }
 0x1e5   : > { %3404 = vst.msk [vmem:[%s6069_s28 + $0x24] sm:$0xf] %vm3394_vm9, %v3853_v7  ;;  %v3248_v54 = vsel %vm3177_vm6, %v3145_v48, %v3216_v30  ;;  %vm3175_vm7 = vcmp.ge.f32.partialorder %v3143_v8, 0.0  ;;  %v3214_v13 = vmul.f32 %v6031_v33, %v3143_v8  ;;  %v2896_v31 = vadd.f32 %v2817_v38, %v6067_v47 }
 0x1e6   : > { %v3858_v44 = vpack.c.bf16 %v3248_v54, %v3248_v54  ;;  %vm3178_vm8 = vcmp.ge.f32.partialorder %v3146_v51, 0.0  ;;  %v3217_v58 = vmul.f32 %v6031_v33, %v3146_v51  ;;  %v3144_v62 = vadd.f32 %v6011_v46, %v3105_v27  ;;  %v4289_v34 = vpop.f32.mrf.mxu1  ;;  %v3032_v25 = vpop.f32.mrf.mxu0 }
 0x1e7   : > { %v3246_v41 = vsel %vm3175_vm7, %v3143_v8, %v3214_v13  ;;  %v3110_v32 = vadd.f32 %v4322_v23, %v2898_v10  ;;  %v3108_v14 = vadd.f32 %v3029_v43, %v2896_v31  ;;  %v2899_v3 = vadd.f32 %v4289_v34, %v6081_v11  ;;  %v6479_v11 = vld [vmem:[#allocation7_spill] sm:$0xff]  ;;  %v6482_v43 = vld [vmem:[#allocation36_spill] sm:$0xff] }
 0x1e8   : > { %3409 = vst.msk [vmem:[%s6069_s28 + $0x38] sm:$0xf] %vm3394_vm9, %v3858_v44  ;;  %v3856_v39 = vpack.c.bf16 %v3246_v41, %v3246_v41  ;;  %v3249_v52 = vsel %vm3178_vm8, %v3146_v51, %v3217_v58  ;;  %vm3176_vm10 = vcmp.ge.f32.partialorder %v3144_v62, 0.0  ;;  %v3215_v47 = vmul.f32 %v6031_v33, %v3144_v62  ;;  %v2820_v45 = vpop.f32.mrf.mxu1  ;;  %v4326_v2 = vpop.f32.mrf.mxu0  ;;  %v6484_v13 = vld [vmem:[#allocation40_spill] sm:$0xff] }
 0x1e9   : > { %v3859_v60 = vpack.c.bf16 %v3249_v52, %v3249_v52  ;;  %v3149_v29 = vadd.f32 %v6011_v46, %v3110_v32  ;;  %v3147_v0 = vadd.f32 %v6011_v46, %v3108_v14  ;;  %v3111_v19 = vadd.f32 %v4323_v28, %v2899_v3  ;;  %v6483_v28 = vld [vmem:[#allocation38_spill] sm:$0xff]  ;;  %v6485_v32 = vld [vmem:[#allocation21_spill] sm:$0xff]  ;;  %v6486_v14 = vld [vmem:[#allocation43_spill] sm:$0xff] }
 0x1ea   : > { %v2273_v24 = vadd.f32 %v6480_v12, %v6479_v11  ;;  %3407 = vst.msk [vmem:[%s6069_s28 + $0x30] sm:$0xf] %vm3394_vm9, %v3856_v39  ;;  %v3247_v55 = vsel %vm3176_vm10, %v3144_v62, %v3215_v47  ;;  %v2897_v15 = vadd.f32 %v2820_v45, %v6093_v50  ;;  %v4292_v23 = vpop.f32.mrf.mxu1  ;;  %v3045_v56 = vpop.f32.mrf.mxu0  ;;  %v6481_v50 = vld [vmem:[#allocation34_spill] sm:$0xff]  ;;  %v6189_v7 = vadd.f32 %v6482_v43, %v2270_v36 }
 0x1eb   : > { %3410 = vst.msk [vmem:[%s6069_s28 + $0x3c] sm:$0xf] %vm3394_vm9, %v3859_v60  ;;  %v3857_v48 = vpack.c.bf16 %v3247_v55, %v3247_v55  ;;  %vm3181_vm11 = vcmp.ge.f32.partialorder %v3149_v29, 0.0  ;;  %v3220_v37 = vmul.f32 %v6031_v33, %v3149_v29  ;;  %vm3179_vm12 = vcmp.ge.f32.partialorder %v3147_v0, 0.0 }
 0x1ec   : > { %v3218_v20 = vmul.f32 %v6031_v33, %v3147_v0  ;;  %v3150_v63 = vadd.f32 %v6011_v46, %v3111_v19  ;;  %v3109_v59 = vadd.f32 %v3032_v25, %v2897_v15  ;;  %v2902_v26 = vadd.f32 %v4292_v23, %v6102_v53  ;;  %v2833_v57 = vpop.f32.mrf.mxu1  ;;  %v4327_v42 = vpop.f32.mrf.mxu0 }
 0x1ed   : > { %v2692_v22 = vadd.f32 %v6481_v50, %v2267_v5  ;;  %3408 = vst.msk [vmem:[%s6069_s28 + $0x34] sm:$0xf] %vm3394_vm9, %v3857_v48  ;;  %v3252_v30 = vsel %vm3181_vm11, %v3149_v29, %v3220_v37  ;;  %v2900_v8 = vadd.f32 %v2833_v57, %v6124_v21  ;;  %v2693_v54 = vadd.f32 %v6483_v28, %v2268_v4  ;;  %v6488_v57 = vld [vmem:[#allocation19_spill] sm:$0xff] }
 0x1ee   : > { %v3862_v9 = vpack.c.bf16 %v3252_v30, %v3252_v30  ;;  %v3250_v17 = vsel %vm3179_vm12, %v3147_v0, %v3218_v20  ;;  %vm3182_vm13 = vcmp.ge.f32.partialorder %v3150_v63, 0.0  ;;  %v3221_v51 = vmul.f32 %v6031_v33, %v3150_v63  ;;  %v4293_v53 = vpop.f32.mrf.mxu1  ;;  %v3048_v27 = vpop.f32.mrf.mxu0 }
 0x1ef   : > { %v3860_v10 = vpack.c.bf16 %v3250_v17, %v3250_v17  ;;  %v3148_v5 = vadd.f32 %v6011_v46, %v3109_v59  ;;  %v3114_v38 = vadd.f32 %v4326_v2, %v2902_v26  ;;  %v3112_v36 = vadd.f32 %v3045_v56, %v2900_v8  ;;  %v6487_v59 = vld [vmem:[#allocation9_spill] sm:$0xff] }
 0x1f0   : > { %v6198_v31 = vadd.f32 %v6484_v13, %v2273_v24  ;;  %3413 = vst.msk [vmem:[%s6069_s28 + $0x48] sm:$0xf] %vm3394_vm9, %v3862_v9  ;;  %v3253_v21 = vsel %vm3182_vm13, %v3150_v63, %v3221_v51  ;;  %v2903_v44 = vadd.f32 %v4293_v53, %v6136_v1  ;;  %v2836_v58 = vpop.f32.mrf.mxu1  ;;  %v4330_v62 = vpop.f32.mrf.mxu0  ;;  %v2271_v3 = vadd.f32 %v6486_v14, %v6485_v32 }
 0x1f1   : > { %3411 = vst.msk [vmem:[%s6069_s28 + $0x40] sm:$0xf] %vm3394_vm9, %v3860_v10  ;;  %v3863_v34 = vpack.c.bf16 %v3253_v21, %v3253_v21  ;;  %vm3180_vm14 = vcmp.ge.f32.partialorder %v3148_v5, 0.0  ;;  %v3219_v25 = vmul.f32 %v6031_v33, %v3148_v5  ;;  %v3153_v41 = vadd.f32 %v6011_v46, %v3114_v38  ;;  %v6489_v10 = vld [vmem:[#allocation42_spill] sm:$0xff] }
 0x1f2   : > { %v3151_v39 = vadd.f32 %v6011_v46, %v3112_v36  ;;  %v3115_v52 = vadd.f32 %v4327_v42, %v2903_v44  ;;  %v2901_v47 = vadd.f32 %v2836_v58, %v6139_v61  ;;  %v4296_v45 = vpop.f32.mrf.mxu1  ;;  %v3061_v1 = vpop.f32.mrf.mxu0  ;;  %v2274_v26 = vadd.f32 %v5984_v35, %v6487_v59 }
 0x1f3   : > { %3414 = vst.msk [vmem:[%s6069_s28 + $0x4c] sm:$0xf] %vm3394_vm9, %v3863_v34  ;;  %v3251_v2 = vsel %vm3180_vm14, %v3148_v5, %v3219_v25  ;;  %vm3185_vm15 = vcmp.ge.f32.partialorder %v3153_v41, 0.0  ;;  %v3224_v60 = vmul.f32 %v6031_v33, %v3153_v41  ;;  %v2906_v29 = vadd.f32 %v4296_v45, %v6147_v49  ;;  %v6490_v34 = vld [vmem:[#allocation44_spill] sm:$0xff] }
 0x1f4   : > { %v3861_v0 = vpack.c.bf16 %v3251_v2, %v3251_v2  ;;  %vm3183_vm0 = vcmp.ge.f32.partialorder %v3151_v39, 0.0  ;;  %v3222_v19 = vmul.f32 %v6031_v33, %v3151_v39  ;;  %v3154_v16 = vadd.f32 %v6011_v46, %v3115_v52  ;;  %v2849_v6 = vpop.f32.mrf.mxu1  ;;  %v4331_v4 = vpop.f32.mrf.mxu0 }
 0x1f5   : > { %v3256_v61 = vsel %vm3185_vm15, %v3153_v41, %v3224_v60  ;;  %v3113_v11 = vadd.f32 %v3048_v27, %v2901_v47  ;;  %v3118_v12 = vadd.f32 %v4330_v62, %v2906_v29  ;;  %v2904_v24 = vadd.f32 %v2849_v6, %v2692_v22 }
 0x1f6   : > { %3412 = vst.msk [vmem:[%s6069_s28 + $0x44] sm:$0xf] %vm3394_vm9, %v3861_v0  ;;  %v3866_v55 = vpack.c.bf16 %v3256_v61, %v3256_v61  ;;  %v3254_v15 = vsel %vm3183_vm0, %v3151_v39, %v3222_v19  ;;  %vm3186_vm1 = vcmp.ge.f32.partialorder %v3154_v16, 0.0  ;;  %v3225_v49 = vmul.f32 %v6031_v33, %v3154_v16  ;;  %v4297_v23 = vpop.f32.mrf.mxu1  ;;  %v3064_v56 = vpop.f32.mrf.mxu0 }
 0x1f7   : > { %v3864_v48 = vpack.c.bf16 %v3254_v15, %v3254_v15  ;;  %v3152_v37 = vadd.f32 %v6011_v46, %v3113_v11  ;;  %v3157_v20 = vadd.f32 %v6011_v46, %v3118_v12  ;;  %v3116_v63 = vadd.f32 %v3061_v1, %v2904_v24 }
 0x1f8   : > { %v2272_v42 = vadd.f32 %v5990_v40, %v6488_v57  ;;  %3417 = vst.msk [vmem:[%s6069_s28 + $0x58] sm:$0xf] %vm3394_vm9, %v3866_v55  ;;  %v3257_v50 = vsel %vm3186_vm1, %v3154_v16, %v3225_v49  ;;  %v2907_v22 = vadd.f32 %v4297_v23, %v6189_v7  ;;  %v2852_v43 = vpop.f32.mrf.mxu1  ;;  %v4334_v30 = vpop.f32.mrf.mxu0  ;;  %v2696_v7 = vadd.f32 %v6489_v10, %v2271_v3 }
 0x1f9   : > { %3415 = vst.msk [vmem:[%s6069_s28 + $0x50] sm:$0xf] %vm3394_vm9, %v3864_v48  ;;  %v3867_v8 = vpack.c.bf16 %v3257_v50, %v3257_v50  ;;  %vm3184_vm2 = vcmp.ge.f32.partialorder %v3152_v37, 0.0  ;;  %v3223_v9 = vmul.f32 %v6031_v33, %v3152_v37  ;;  %vm3189_vm3 = vcmp.ge.f32.partialorder %v3157_v20, 0.0 }
 0x1fa   : > { %v3228_v35 = vmul.f32 %v6031_v33, %v3157_v20  ;;  %v3155_v17 = vadd.f32 %v6011_v46, %v3116_v63  ;;  %v3119_v40 = vadd.f32 %v4331_v4, %v2907_v22  ;;  %v2905_v51 = vadd.f32 %v2852_v43, %v2693_v54  ;;  %v4300_v53 = vpop.f32.mrf.mxu1  ;;  %v3077_v27 = vpop.f32.mrf.mxu0 }
 0x1fb   : > { %3418 = vst.msk [vmem:[%s6069_s28 + $0x5c] sm:$0xf] %vm3394_vm9, %v3867_v8  ;;  %v3255_v5 = vsel %vm3184_vm2, %v3152_v37, %v3223_v9  ;;  %v2910_v38 = vadd.f32 %v4300_v53, %v6198_v31  ;;  %v2699_v25 = vadd.f32 %v6490_v34, %v2274_v26  ;;  %v2697_v41 = vadd.f32 %v5986_v18, %v2272_v42 }
 0x1fc   : > { %v3865_v36 = vpack.c.bf16 %v3255_v5, %v3255_v5  ;;  %v3260_v28 = vsel %vm3189_vm3, %v3157_v20, %v3228_v35  ;;  %vm3187_vm4 = vcmp.ge.f32.partialorder %v3155_v17, 0.0  ;;  %v3226_v13 = vmul.f32 %v6031_v33, %v3155_v17  ;;  %v2865_v21 = vpop.f32.mrf.mxu1  ;;  %v4335_v3 = vpop.f32.mrf.mxu0 }
 0x1fd   : > { %v3870_v44 = vpack.c.bf16 %v3260_v28, %v3260_v28  ;;  %v3158_v54 = vadd.f32 %v6011_v46, %v3119_v40  ;;  %v3117_v58 = vadd.f32 %v3064_v56, %v2905_v51  ;;  %v3122_v62 = vadd.f32 %v4334_v30, %v2910_v38 }
 0x1fe   : > { %3416 = vst.msk [vmem:[%s6069_s28 + $0x54] sm:$0xf] %vm3394_vm9, %v3865_v36  ;;  %v3258_v31 = vsel %vm3187_vm4, %v3155_v17, %v3226_v13  ;;  %v2908_v32 = vadd.f32 %v2865_v21, %v2696_v7  ;;  %v4301_v14 = vpop.f32.mrf.mxu1  ;;  %v3080_v4 = vpop.f32.mrf.mxu0 }
 0x1ff   : > { %3421 = vst.msk [vmem:[%s6069_s28 + $0x68] sm:$0xf] %vm3394_vm9, %v3870_v44  ;;  %v3868_v39 = vpack.c.bf16 %v3258_v31, %v3258_v31  ;;  %vm3190_vm5 = vcmp.ge.f32.partialorder %v3158_v54, 0.0  ;;  %v3229_v52 = vmul.f32 %v6031_v33, %v3158_v54  ;;  %v3156_v47 = vadd.f32 %v6011_v46, %v3117_v58 }
 0x200   : > { %v3161_v45 = vadd.f32 %v6011_v46, %v3122_v62  ;;  %v3120_v1 = vadd.f32 %v3077_v27, %v2908_v32  ;;  %v2911_v2 = vadd.f32 %v4301_v14, %v2699_v25  ;;  %v2868_v18 = vpop.f32.mrf.mxu1 }
 0x201   : > { %3419 = vst.msk [vmem:[%s6069_s28 + $0x60] sm:$0xf] %vm3394_vm9, %v3868_v39  ;;  %v3261_v60 = vsel %vm3190_vm5, %v3158_v54, %v3229_v52  ;;  %vm3188_vm6 = vcmp.ge.f32.partialorder %v3156_v47, 0.0  ;;  %v3227_v29 = vmul.f32 %v6031_v33, %v3156_v47  ;;  %v2909_v0 = vadd.f32 %v2868_v18, %v2697_v41 }
 0x202   : > { %v3871_v19 = vpack.c.bf16 %v3261_v60, %v3261_v60  ;;  %vm3193_vm7 = vcmp.ge.f32.partialorder %v3161_v45, 0.0  ;;  %v3232_v16 = vmul.f32 %v6031_v33, %v3161_v45  ;;  %v3159_v6 = vadd.f32 %v6011_v46, %v3120_v1 }
 0x203   : > { %v3259_v61 = vsel %vm3188_vm6, %v3156_v47, %v3227_v29  ;;  %v3123_v11 = vadd.f32 %v4335_v3, %v2911_v2  ;;  %v3121_v12 = vadd.f32 %v3080_v4, %v2909_v0 }
 0x204   : > { %3422 = vst.msk [vmem:[%s6069_s28 + $0x6c] sm:$0xf] %vm3394_vm9, %v3871_v19  ;;  %v3869_v24 = vpack.c.bf16 %v3259_v61, %v3259_v61  ;;  %v3264_v55 = vsel %vm3193_vm7, %v3161_v45, %v3232_v16  ;;  %vm3191_vm8 = vcmp.ge.f32.partialorder %v3159_v6, 0.0  ;;  %v3230_v15 = vmul.f32 %v6031_v33, %v3159_v6 }
 0x205   : > { %v3874_v49 = vpack.c.bf16 %v3264_v55, %v3264_v55  ;;  %v3162_v23 = vadd.f32 %v6011_v46, %v3123_v11  ;;  %v3160_v56 = vadd.f32 %v6011_v46, %v3121_v12 }
 0x206   : > { %3420 = vst.msk [vmem:[%s6069_s28 + $0x64] sm:$0xf] %vm3394_vm9, %v3869_v24  ;;  %v3262_v48 = vsel %vm3191_vm8, %v3159_v6, %v3230_v15 }
 0x207   : > { %3425 = vst.msk [vmem:[%s6069_s28 + $0x78] sm:$0xf] %vm3394_vm9, %v3874_v49  ;;  %v3872_v37 = vpack.c.bf16 %v3262_v48, %v3262_v48  ;;  %vm3194_vm10 = vcmp.ge.f32.partialorder %v3162_v23, 0.0  ;;  %v3233_v20 = vmul.f32 %v6031_v33, %v3162_v23  ;;  %vm3192_vm11 = vcmp.ge.f32.partialorder %v3160_v56, 0.0 }
 0x208   : > { %v3231_v63 = vmul.f32 %v6031_v33, %v3160_v56 }
 0x209   : > { %3423 = vst.msk [vmem:[%s6069_s28 + $0x70] sm:$0xf] %vm3394_vm9, %v3872_v37  ;;  %v3265_v46 = vsel %vm3194_vm10, %v3162_v23, %v3233_v20 }
 0x20a   : > { %v3875_v59 = vpack.c.bf16 %v3265_v46, %v3265_v46  ;;  %v3263_v26 = vsel %vm3192_vm11, %v3160_v56, %v3231_v63 }
 0x20b   : > { %v3873_v57 = vpack.c.bf16 %v3263_v26, %v3263_v26 }
 0x20c   : > { %3426 = vst.msk [vmem:[%s6069_s28 + $0x7c] sm:$0xf] %vm3394_vm9, %v3875_v59 }
 0x20d   : > { %3424 = vst.msk [vmem:[%s6069_s28 + $0x74] sm:$0xf] %vm3394_vm9, %v3873_v57 }
 0x20e   : > { %4444 = shalt.err (!%p4441_p5)
}
 0x20f   : > { %s4445_s16 = scalar_lea.hbm %s6272_s12, 2048  ;;  %s4449_s20 = scalar_lea.hbm %s6333_s6, 4096 }
 0x210   : > { %p4446_p6 = scmp.ne.s32.totalorder %s6272_s12, %s4445_s16  ;;  %p4450_p10 = scmp.lt.s32.totalorder %s6272_s12, %s6333_s6 }
 0x211   : > { %p4451_p11 = scmp.lt.s32.totalorder %s4449_s20, %s4445_s16 }
 0x212   : > { %p4447_p7 = pnand %p4446_p6, %p4588_p4 }
 0x213   : > { %p4452_p12 = por %p4451_p11, %p4450_p10 }
 0x214   : > { %p4448_p9 = pneg %p4447_p7 }
 0x216   : > { %p4453_p13 = pnand %p4452_p12, %p4448_p9 }
 0x218   : > { %4456 = shalt.err (!%p4453_p13)
}
 0x219   : > { %s4511_s8 = smov 64   ;;  %s4512_s11 = smov 4  }
 0x21a   : > { %4340 = dma.vmem_to_hbm [thread:$0]  (%p4588_p4), %s6274_s30, 2048, %s6272_s12, %s6282_s24, %s4511_s8, %s4511_s8, %s4512_s11  }
 0x21b PF: > { %p4347_p0 = scmp.ge.s32.totalorder %s4507_s26, 2  ;;  %s3459_s13 = sand.u32 1, %s4487_s21  }
 0x21c   : > { %s3460_s14 = scalar_lea.sflag [#allocation3], %s3459_s13 }
 0x21d   : > { %p4343_p1 = pnand %p4347_p0, %p4595_p8 }
 0x21f   : > { %p4344_p2 = pneg %p4343_p1 }
 0x221   : > { %4482 = dma.done.wait (%p4344_p2), %s3460_s14, 2048  }
 0x222   : > { %4484 = vsyncadd (%p4344_p2), %s3460_s14, 4294965248  ;;  %s19_s26 = sadd.s32 1, %s4507_s26   ;;  %s6491_s21 = smov %s4491_s22 }
 0x223   : > { %p16_p3 = scmp.ge.s32.totalorder %s19_s26, 4   ;;  %s6492_s22 = smov %s4495_s23 }
 0x224   : > { %s6493_s23 = smov %s4601_s10  ;;  %s6494_s24 = smov %s4503_s25 }
 0x225   : > { %s6495_s25 = smov %s6497_s29  ;;  %18 = sbr.rel (!%p16_p3) target bundleno = 4 (0x4), region = 93 }
 0x22a   :  { %3465 = vsyncpa [#allocation3], 1 }
 0x22b   :  { %3467 = vsyncpa [#allocation3 + $0x1], 1 }

</bundles_post_ra>
